<compile_context>
chip_gen: v7x
topology: tpu7x:2x2x1
jax: 0.10.0
libtpu: 0.0.40
codegen_flags: <defaults>
</compile_context>

<pallas_src>
import functools

import jax
import jax.numpy as jnp
from jax.experimental import pallas as pl
from jax.experimental.pallas import tpu as pltpu

_VMEM_LIMIT = 32 * 1024 * 1024  # safe on v5e (16 MiB scoped default) and v7x (64 MiB phys)


def _quick_gelu(x):
    # QuickGELU: x * sigmoid(1.702 * x)
    return x * (1.0 / (1.0 + jnp.exp(-1.702 * x)))


def _pick_row_tile(m):
    # Largest multiple-of-8 row tile <= 256 that divides m while leaving at
    # least 2 grid steps (so both v7x TensorCores get parallel work).
    for cand in (256, 128, 64, 32, 16, 8):
        if m % cand == 0 and m // cand >= 2:
            return cand
    return m


# ------------------ Kernel 1: patch-embed matmul + BN statistics ------------------

def _encode_kernel(p_ref, w_ref, y_ref, sum_ref, ssq_ref):
    i = pl.program_id(0)
    y = jnp.dot(p_ref[...], w_ref[...], preferred_element_type=jnp.float32)
    y_ref[...] = y.astype(y_ref.dtype)

    @pl.when(i == 0)
    def _():
        sum_ref[...] = jnp.zeros_like(sum_ref)
        ssq_ref[...] = jnp.zeros_like(ssq_ref)

    sum_ref[...] += jnp.sum(y, axis=0, keepdims=True)
    ssq_ref[...] += jnp.sum(y * y, axis=0, keepdims=True)


def patch_embed_and_stats(patches, w_conv):
    m, k = patches.shape
    d = w_conv.shape[1]
    tm = _pick_row_tile(m)
    cost = pl.CostEstimate(
        flops=2 * m * k * d + 4 * m * d,
        transcendentals=0,
        bytes_accessed=4 * (m * k + k * d + m * d + 2 * d),
    )
    return pl.pallas_call(
        _encode_kernel,
        out_shape=(
            jax.ShapeDtypeStruct((m, d), jnp.float32),
            jax.ShapeDtypeStruct((1, d), jnp.float32),
            jax.ShapeDtypeStruct((1, d), jnp.float32),
        ),
        grid_spec=pltpu.PrefetchScalarGridSpec(
            num_scalar_prefetch=0,
            grid=(m // tm,),
            in_specs=[
                pl.BlockSpec((tm, k), lambda i: (i, 0)),
                pl.BlockSpec((k, d), lambda i: (0, 0)),
            ],
            out_specs=[
                pl.BlockSpec((tm, d), lambda i: (i, 0)),
                pl.BlockSpec((1, d), lambda i: (0, 0)),
                pl.BlockSpec((1, d), lambda i: (0, 0)),
            ],
        ),
        compiler_params=pltpu.CompilerParams(
            dimension_semantics=("arbitrary",),  # stats accumulate across row tiles
            vmem_limit_bytes=_VMEM_LIMIT,
        ),
        cost_estimate=cost,
    )(patches, w_conv)


# -------------- Kernel 2: fused BatchNorm + full decoder MLP chain --------------

def _decoder_kernel(x_ref, scale_ref, shift_ref,
                    w0_ref, b0_ref, w1_ref, b1_ref,
                    w2_ref, b2_ref, w3_ref, b3_ref, o_ref):
    h = x_ref[...] * scale_ref[...] + shift_ref[...]          # folded BatchNorm1d
    h = _quick_gelu(jnp.dot(h, w0_ref[...], preferred_element_type=jnp.float32) + b0_ref[...])
    h = _quick_gelu(jnp.dot(h, w1_ref[...], preferred_element_type=jnp.float32) + b1_ref[...])
    h = _quick_gelu(jnp.dot(h, w2_ref[...], preferred_element_type=jnp.float32) + b2_ref[...])
    y = jnp.dot(h, w3_ref[...], preferred_element_type=jnp.float32) + b3_ref[...]
    o_ref[...] = y.astype(o_ref.dtype)


def fused_decoder(x_emb, scale, shift, w_lin, b_lin, w_d0, b_d0, w_d1, b_d1, w_d2, b_d2):
    m, d = x_emb.shape
    d2 = w_d0.shape[1]
    d4 = w_d1.shape[1]
    dout = w_d2.shape[1]
    tm = _pick_row_tile(m)
    # TODO(synk): at production sizes (D=768, dout=4096) the resident weights
    # (~76 MB f32) exceed VMEM; there the deprojection needs K/N tiling via an
    # extra grid axis.  At these test sizes they are ~1.3 MB and stay resident.
    flops = 2 * m * (d * d + d * d2 + d2 * d4 + d4 * dout)
    trans = m * (d + d2 + d4)
    bytes_acc = 4 * (m * d + 2 * d + d * d + d + d * d2 + d2 + d2 * d4 + d4
                     + d4 * dout + dout + m * dout)

    def full(shape):
        return pl.BlockSpec(shape, lambda i: (0, 0))

    return pl.pallas_call(
        _decoder_kernel,
        out_shape=jax.ShapeDtypeStruct((m, dout), jnp.float32),
        grid_spec=pltpu.PrefetchScalarGridSpec(
            num_scalar_prefetch=0,
            grid=(m // tm,),
            in_specs=[
                pl.BlockSpec((tm, d), lambda i: (i, 0)),   # embeddings (row tile)
                full((1, d)), full((1, d)),                # BN scale / shift
                full((d, d)), full((1, d)),                # linear
                full((d, d2)), full((1, d2)),              # deprojection[0]
                full((d2, d4)), full((1, d4)),             # deprojection[2]
                full((d4, dout)), full((1, dout)),         # deprojection[4]
            ],
            out_specs=pl.BlockSpec((tm, dout), lambda i: (i, 0)),
        ),
        compiler_params=pltpu.CompilerParams(
            dimension_semantics=("parallel",),
            vmem_limit_bytes=_VMEM_LIMIT,
        ),
        cost_estimate=pl.CostEstimate(
            flops=flops, transcendentals=trans, bytes_accessed=bytes_acc),
    )(x_emb, scale, shift, w_lin, b_lin, w_d0, b_d0, w_d1, b_d1, w_d2, b_d2)


# ------------------------------- full forward -------------------------------

@functools.partial(jax.jit, static_argnames=("patch_size", "out_channels"))
def pretrain_forward(x, params, *, patch_size, out_channels):
    eps = 1e-5
    b, c_in, hh, ww = x.shape
    p = patch_size
    n_h, n_w = hh // p, ww // p
    m = b * n_h * n_w

    # Encoder: im2patch (layout only), feature order (c, dy, dx) matches the
    # Conv2d weight flattening.
    patches = x.reshape(b, c_in, n_h, p, n_w, p)
    patches = patches.transpose(0, 2, 4, 1, 3, 5).reshape(m, c_in * p * p)

    x_emb, col_sum, col_ssq = patch_embed_and_stats(patches, params["w_conv"])

    # BatchNorm1d (training-mode batch statistics, per channel over all tokens)
    mean = col_sum / m
    var = col_ssq / m - mean * mean
    inv = 1.0 / jnp.sqrt(var + eps)
    scale = params["gamma"] * inv
    shift = params["beta"] - mean * scale
    # TODO(synk): nn.Dropout(0.1) is stochastic in train mode; treated as identity here.

    # Decoder (normalization fused into the MLP-chain kernel)
    y = fused_decoder(x_emb, scale, shift,
                      params["w_lin"], params["b_lin"],
                      params["w_d0"], params["b_d0"],
                      params["w_d1"], params["b_d1"],
                      params["w_d2"], params["b_d2"])

    # rearrange 'b (n_h n_w) (c h w) -> b c (n_h h) (n_w w)'  (layout only)
    y = y.reshape(b, n_h, n_w, out_channels, p, p)
    y = y.transpose(0, 3, 1, 4, 2, 5).reshape(b, out_channels, n_h * p, n_w * p)
    return y


def reference_forward(x, params, *, patch_size, out_channels):
    eps = 1e-5
    b, c_in, hh, ww = x.shape
    p = patch_size
    n_h, n_w = hh // p, ww // p
    patches = x.reshape(b, c_in, n_h, p, n_w, p)
    patches = patches.transpose(0, 2, 4, 1, 3, 5).reshape(b * n_h * n_w, c_in * p * p)
    emb = patches @ params["w_conv"]
    mean = emb.mean(axis=0, keepdims=True)
    var = emb.var(axis=0, keepdims=True)
    h = (emb - mean) / jnp.sqrt(var + eps) * params["gamma"] + params["beta"]

    def qg(t):
        return t * jax.nn.sigmoid(1.702 * t)

    h = qg(h @ params["w_lin"] + params["b_lin"])
    h = qg(h @ params["w_d0"] + params["b_d0"])
    h = qg(h @ params["w_d1"] + params["b_d1"])
    y = h @ params["w_d2"] + params["b_d2"]
    y = y.reshape(b, n_h, n_w, out_channels, p, p)
    y = y.transpose(0, 3, 1, 4, 2, 5).reshape(b, out_channels, n_h * p, n_w * p)
    return y


if __name__ == "__main__":
    key = jax.random.PRNGKey(0)
    B, C_IN, IMG = 4, 1, 32     # small config: input_size=32, input_dim=1
    P = 16                      # patch_size
    D = 128                     # embedding_dim (lane-dense)
    C_OUT = 1                   # output_dim; output_size == input_size
    OUTP = C_OUT * P * P

    ks = jax.random.split(key, 12)
    norm = jax.random.normal
    params = {
        "w_conv": norm(ks[0], (C_IN * P * P, D), jnp.float32) / jnp.sqrt(C_IN * P * P),
        "gamma": 1.0 + 0.1 * norm(ks[1], (1, D), jnp.float32),
        "beta": 0.1 * norm(ks[2], (1, D), jnp.float32),
        "w_lin": norm(ks[3], (D, D), jnp.float32) / jnp.sqrt(D),
        "b_lin": 0.02 * norm(ks[4], (1, D), jnp.float32),
        "w_d0": norm(ks[5], (D, 2 * D), jnp.float32) / jnp.sqrt(D),
        "b_d0": 0.02 * norm(ks[6], (1, 2 * D), jnp.float32),
        "w_d1": norm(ks[7], (2 * D, 4 * D), jnp.float32) / jnp.sqrt(2 * D),
        "b_d1": 0.02 * norm(ks[8], (1, 4 * D), jnp.float32),
        "w_d2": norm(ks[9], (4 * D, OUTP), jnp.float32) / jnp.sqrt(4 * D),
        "b_d2": 0.02 * norm(ks[10], (1, OUTP), jnp.float32),
    }
    x = norm(ks[11], (B, C_IN, IMG, IMG), jnp.float32)

    out = pretrain_forward(x, params, patch_size=P, out_channels=C_OUT)
    out = jax.block_until_ready(out)
    ref = reference_forward(x, params, patch_size=P, out_channels=C_OUT)

    assert out.shape == (B, C_OUT, IMG, IMG), out.shape
    rel = float(jnp.max(jnp.abs(out - ref))) / (float(jnp.max(jnp.abs(ref))) + 1e-6)
    assert rel < 3e-2, f"mismatch vs reference: rel_err={rel}"
    print("KERNEL_OK")
</pallas_src>

<mosaic_0001>
module attributes {stable_mosaic.version = 11 : i64} {
  func.func @_encode_kernel(%arg0: i32, %arg1: memref<8x256xf32, #tpu.memory_space<vmem>>, %arg2: memref<256x128xf32, #tpu.memory_space<vmem>>, %arg3: memref<8x128xf32, #tpu.memory_space<vmem>>, %arg4: memref<1x128xf32, #tpu.memory_space<vmem>>, %arg5: memref<1x128xf32, #tpu.memory_space<vmem>>) attributes {dimension_semantics = [#tpu.dimension_semantics<arbitrary>], iteration_bounds = array<i64: 2>, scalar_prefetch = 0 : i64, scratch_operands = 0 : i64, tpu.core_type = #tpu.core_type<tc>, window_params = [{transform_indices = @transform_0, window_bounds = array<i64: 8, 256>}, {pipeline_mode = #tpu.pipeline_mode<synchronous>, transform_indices = @transform_1, window_bounds = array<i64: 256, 128>}, {transform_indices = @transform_2, window_bounds = array<i64: 8, 128>}, {pipeline_mode = #tpu.pipeline_mode<synchronous>, transform_indices = @transform_3, window_bounds = array<i64: 1, 128>}, {pipeline_mode = #tpu.pipeline_mode<synchronous>, transform_indices = @transform_4, window_bounds = array<i64: 1, 128>}]} {
    %c0 = arith.constant 0 : index
    %c0_0 = arith.constant 0 : index
    %0 = vector.load %arg1[%c0, %c0_0] : memref<8x256xf32, #tpu.memory_space<vmem>>, vector<8x256xf32>
    %c0_1 = arith.constant 0 : index
    %c0_2 = arith.constant 0 : index
    %1 = vector.load %arg2[%c0_1, %c0_2] : memref<256x128xf32, #tpu.memory_space<vmem>>, vector<256x128xf32>
    %cst = arith.constant dense<0.000000e+00> : vector<8x128xf32>
    %2 = tpu.matmul %0, %1, %cst {dimension_numbers = #tpu.dot_dimension_numbers<[1], [0], [0], [1], [0, 0, 1, 1], [], []>} : vector<8x256xf32>, vector<256x128xf32>, vector<8x128xf32> -> vector<8x128xf32>
    %c0_3 = arith.constant 0 : index
    %c0_4 = arith.constant 0 : index
    %3 = vector.load %arg3[%c0_3, %c0_4] : memref<8x128xf32, #tpu.memory_space<vmem>>, vector<8x128xf32>
    tpu.vector_store %arg3[%c0_3, %c0_4], %2 {strides = array<i32>} : memref<8x128xf32, #tpu.memory_space<vmem>>, vector<8x128xf32>,
    %c0_i32 = arith.constant 0 : i32
    %4 = arith.cmpi eq, %arg0, %c0_i32 : i32
    %5 = arith.extui %4 : i1 to i32
    %c0_i32_5 = arith.constant 0 : i32
    %6 = arith.cmpi ne, %5, %c0_i32_5 : i32
    scf.if %6 {
      %cst_16 = arith.constant 0.000000e+00 : f32
      %18 = vector.broadcast %cst_16 : f32 to vector<1x128xf32>
      %c0_17 = arith.constant 0 : index
      %c0_18 = arith.constant 0 : index
      %19 = vector.load %arg4[%c0_17, %c0_18] : memref<1x128xf32, #tpu.memory_space<vmem>>, vector<1x128xf32>
      tpu.vector_store %arg4[%c0_17, %c0_18], %18 {strides = array<i32>} : memref<1x128xf32, #tpu.memory_space<vmem>>, vector<1x128xf32>,
      %cst_19 = arith.constant 0.000000e+00 : f32
      %20 = vector.broadcast %cst_19 : f32 to vector<1x128xf32>
      %c0_20 = arith.constant 0 : index
      %c0_21 = arith.constant 0 : index
      %21 = vector.load %arg5[%c0_20, %c0_21] : memref<1x128xf32, #tpu.memory_space<vmem>>, vector<1x128xf32>
      tpu.vector_store %arg5[%c0_20, %c0_21], %20 {strides = array<i32>} : memref<1x128xf32, #tpu.memory_space<vmem>>, vector<1x128xf32>,
    } else {
    }
    %c0_6 = arith.constant 0 : index
    %c0_7 = arith.constant 0 : index
    %7 = vector.load %arg4[%c0_6, %c0_7] : memref<1x128xf32, #tpu.memory_space<vmem>>, vector<1x128xf32>
    %cst_8 = arith.constant dense<0.000000e+00> : vector<128xf32>
    %8 = vector.multi_reduction <add>, %2, %cst_8 [0] : vector<8x128xf32> to vector<128xf32>
    %9 = vector.shape_cast %8 : vector<128xf32> to vector<1x128xf32>
    %10 = arith.addf %7, %9 : vector<1x128xf32>
    %c0_9 = arith.constant 0 : index
    %c0_10 = arith.constant 0 : index
    %11 = vector.load %arg4[%c0_9, %c0_10] : memref<1x128xf32, #tpu.memory_space<vmem>>, vector<1x128xf32>
    tpu.vector_store %arg4[%c0_9, %c0_10], %10 {strides = array<i32>} : memref<1x128xf32, #tpu.memory_space<vmem>>, vector<1x128xf32>,
    %c0_11 = arith.constant 0 : index
    %c0_12 = arith.constant 0 : index
    %12 = vector.load %arg5[%c0_11, %c0_12] : memref<1x128xf32, #tpu.memory_space<vmem>>, vector<1x128xf32>
    %13 = arith.mulf %2, %2 : vector<8x128xf32>
    %cst_13 = arith.constant dense<0.000000e+00> : vector<128xf32>
    %14 = vector.multi_reduction <add>, %13, %cst_13 [0] : vector<8x128xf32> to vector<128xf32>
    %15 = vector.shape_cast %14 : vector<128xf32> to vector<1x128xf32>
    %16 = arith.addf %12, %15 : vector<1x128xf32>
    %c0_14 = arith.constant 0 : index
    %c0_15 = arith.constant 0 : index
    %17 = vector.load %arg5[%c0_14, %c0_15] : memref<1x128xf32, #tpu.memory_space<vmem>>, vector<1x128xf32>
    tpu.vector_store %arg5[%c0_14, %c0_15], %16 {strides = array<i32>} : memref<1x128xf32, #tpu.memory_space<vmem>>, vector<1x128xf32>,
    return
  }
  func.func @transform_0(%arg0: i32) -> (i32, i32) {
    %c0_i32 = arith.constant 0 : i32
    %c0_i32_0 = arith.constant 0 : i32
    return %arg0, %c0_i32 : i32, i32
  }
  func.func @transform_1(%arg0: i32) -> (i32, i32) {
    %c0_i32 = arith.constant 0 : i32
    %c0_i32_0 = arith.constant 0 : i32
    %c0_i32_1 = arith.constant 0 : i32
    return %c0_i32, %c0_i32_0 : i32, i32
  }
  func.func @transform_2(%arg0: i32) -> (i32, i32) {
    %c0_i32 = arith.constant 0 : i32
    %c0_i32_0 = arith.constant 0 : i32
    return %arg0, %c0_i32 : i32, i32
  }
  func.func @transform_3(%arg0: i32) -> (i32, i32) {
    %c0_i32 = arith.constant 0 : i32
    %c0_i32_0 = arith.constant 0 : i32
    %c0_i32_1 = arith.constant 0 : i32
    return %c0_i32, %c0_i32_0 : i32, i32
  }
  func.func @transform_4(%arg0: i32) -> (i32, i32) {
    %c0_i32 = arith.constant 0 : i32
    %c0_i32_0 = arith.constant 0 : i32
    %c0_i32_1 = arith.constant 0 : i32
    return %c0_i32, %c0_i32_0 : i32, i32
  }
}

module attributes {stable_mosaic.version = 11 : i64} {
  func.func @_decoder_kernel(%arg0: i32, %arg1: memref<8x128xf32, #tpu.memory_space<vmem>>, %arg2: memref<1x128xf32, #tpu.memory_space<vmem>>, %arg3: memref<1x128xf32, #tpu.memory_space<vmem>>, %arg4: memref<128x128xf32, #tpu.memory_space<vmem>>, %arg5: memref<1x128xf32, #tpu.memory_space<vmem>>, %arg6: memref<128x256xf32, #tpu.memory_space<vmem>>, %arg7: memref<1x256xf32, #tpu.memory_space<vmem>>, %arg8: memref<256x512xf32, #tpu.memory_space<vmem>>, %arg9: memref<1x512xf32, #tpu.memory_space<vmem>>, %arg10: memref<512x256xf32, #tpu.memory_space<vmem>>, %arg11: memref<1x256xf32, #tpu.memory_space<vmem>>, %arg12: memref<8x256xf32, #tpu.memory_space<vmem>>) attributes {dimension_semantics = [#tpu.dimension_semantics<parallel>], iteration_bounds = array<i64: 2>, scalar_prefetch = 0 : i64, scratch_operands = 0 : i64, tpu.core_type = #tpu.core_type<tc>, window_params = [{transform_indices = @transform_0, window_bounds = array<i64: 8, 128>}, {pipeline_mode = #tpu.pipeline_mode<synchronous>, transform_indices = @transform_1, window_bounds = array<i64: 1, 128>}, {pipeline_mode = #tpu.pipeline_mode<synchronous>, transform_indices = @transform_2, window_bounds = array<i64: 1, 128>}, {pipeline_mode = #tpu.pipeline_mode<synchronous>, transform_indices = @transform_3, window_bounds = array<i64: 128, 128>}, {pipeline_mode = #tpu.pipeline_mode<synchronous>, transform_indices = @transform_4, window_bounds = array<i64: 1, 128>}, {pipeline_mode = #tpu.pipeline_mode<synchronous>, transform_indices = @transform_5, window_bounds = array<i64: 128, 256>}, {pipeline_mode = #tpu.pipeline_mode<synchronous>, transform_indices = @transform_6, window_bounds = array<i64: 1, 256>}, {pipeline_mode = #tpu.pipeline_mode<synchronous>, transform_indices = @transform_7, window_bounds = array<i64: 256, 512>}, {pipeline_mode = #tpu.pipeline_mode<synchronous>, transform_indices = @transform_8, window_bounds = array<i64: 1, 512>}, {pipeline_mode = #tpu.pipeline_mode<synchronous>, transform_indices = @transform_9, window_bounds = array<i64: 512, 256>}, {pipeline_mode = #tpu.pipeline_mode<synchronous>, transform_indices = @transform_10, window_bounds = array<i64: 1, 256>}, {transform_indices = @transform_11, window_bounds = array<i64: 8, 256>}]} {
    %c0 = arith.constant 0 : index
    %c0_0 = arith.constant 0 : index
    %0 = vector.load %arg1[%c0, %c0_0] : memref<8x128xf32, #tpu.memory_space<vmem>>, vector<8x128xf32>
    %c0_1 = arith.constant 0 : index
    %c0_2 = arith.constant 0 : index
    %1 = vector.load %arg2[%c0_1, %c0_2] : memref<1x128xf32, #tpu.memory_space<vmem>>, vector<1x128xf32>
    %2 = vector.broadcast %1 : vector<1x128xf32> to vector<8x128xf32>
    %3 = arith.mulf %0, %2 : vector<8x128xf32>
    %c0_3 = arith.constant 0 : index
    %c0_4 = arith.constant 0 : index
    %4 = vector.load %arg3[%c0_3, %c0_4] : memref<1x128xf32, #tpu.memory_space<vmem>>, vector<1x128xf32>
    %5 = vector.broadcast %4 : vector<1x128xf32> to vector<8x128xf32>
    %6 = arith.addf %3, %5 : vector<8x128xf32>
    %c0_5 = arith.constant 0 : index
    %c0_6 = arith.constant 0 : index
    %7 = vector.load %arg4[%c0_5, %c0_6] : memref<128x128xf32, #tpu.memory_space<vmem>>, vector<128x128xf32>
    %cst = arith.constant dense<0.000000e+00> : vector<8x128xf32>
    %8 = tpu.matmul %6, %7, %cst {dimension_numbers = #tpu.dot_dimension_numbers<[1], [0], [0], [1], [0, 0, 1, 1], [], []>} : vector<8x128xf32>, vector<128x128xf32>, vector<8x128xf32> -> vector<8x128xf32>
    %c0_7 = arith.constant 0 : index
    %c0_8 = arith.constant 0 : index
    %9 = vector.load %arg5[%c0_7, %c0_8] : memref<1x128xf32, #tpu.memory_space<vmem>>, vector<1x128xf32>
    %10 = vector.broadcast %9 : vector<1x128xf32> to vector<8x128xf32>
    %11 = arith.addf %8, %10 : vector<8x128xf32>
    %cst_9 = arith.constant -1.702000e+00 : f32
    %12 = vector.broadcast %cst_9 : f32 to vector<8x128xf32>
    %13 = arith.mulf %12, %11 : vector<8x128xf32>
    %14 = math.exp %13 : vector<8x128xf32>
    %cst_10 = arith.constant 1.000000e+00 : f32
    %15 = vector.broadcast %cst_10 : f32 to vector<8x128xf32>
    %16 = arith.addf %15, %14 : vector<8x128xf32>
    %cst_11 = arith.constant 1.000000e+00 : f32
    %17 = vector.broadcast %cst_11 : f32 to vector<8x128xf32>
    %18 = arith.divf %17, %16 : vector<8x128xf32>
    %19 = arith.mulf %11, %18 : vector<8x128xf32>
    %c0_12 = arith.constant 0 : index
    %c0_13 = arith.constant 0 : index
    %20 = vector.load %arg6[%c0_12, %c0_13] : memref<128x256xf32, #tpu.memory_space<vmem>>, vector<128x256xf32>
    %cst_14 = arith.constant dense<0.000000e+00> : vector<8x256xf32>
    %21 = tpu.matmul %19, %20, %cst_14 {dimension_numbers = #tpu.dot_dimension_numbers<[1], [0], [0], [1], [0, 0, 1, 1], [], []>} : vector<8x128xf32>, vector<128x256xf32>, vector<8x256xf32> -> vector<8x256xf32>
    %c0_15 = arith.constant 0 : index
    %c0_16 = arith.constant 0 : index
    %22 = vector.load %arg7[%c0_15, %c0_16] : memref<1x256xf32, #tpu.memory_space<vmem>>, vector<1x256xf32>
    %23 = vector.broadcast %22 : vector<1x256xf32> to vector<8x256xf32>
    %24 = arith.addf %21, %23 : vector<8x256xf32>
    %cst_17 = arith.constant -1.702000e+00 : f32
    %25 = vector.broadcast %cst_17 : f32 to vector<8x256xf32>
    %26 = arith.mulf %25, %24 : vector<8x256xf32>
    %27 = math.exp %26 : vector<8x256xf32>
    %cst_18 = arith.constant 1.000000e+00 : f32
    %28 = vector.broadcast %cst_18 : f32 to vector<8x256xf32>
    %29 = arith.addf %28, %27 : vector<8x256xf32>
    %cst_19 = arith.constant 1.000000e+00 : f32
    %30 = vector.broadcast %cst_19 : f32 to vector<8x256xf32>
    %31 = arith.divf %30, %29 : vector<8x256xf32>
    %32 = arith.mulf %24, %31 : vector<8x256xf32>
    %c0_20 = arith.constant 0 : index
    %c0_21 = arith.constant 0 : index
    %33 = vector.load %arg8[%c0_20, %c0_21] : memref<256x512xf32, #tpu.memory_space<vmem>>, vector<256x512xf32>
    %cst_22 = arith.constant dense<0.000000e+00> : vector<8x512xf32>
    %34 = tpu.matmul %32, %33, %cst_22 {dimension_numbers = #tpu.dot_dimension_numbers<[1], [0], [0], [1], [0, 0, 1, 1], [], []>} : vector<8x256xf32>, vector<256x512xf32>, vector<8x512xf32> -> vector<8x512xf32>
    %c0_23 = arith.constant 0 : index
    %c0_24 = arith.constant 0 : index
    %35 = vector.load %arg9[%c0_23, %c0_24] : memref<1x512xf32, #tpu.memory_space<vmem>>, vector<1x512xf32>
    %36 = vector.broadcast %35 : vector<1x512xf32> to vector<8x512xf32>
    %37 = arith.addf %34, %36 : vector<8x512xf32>
    %cst_25 = arith.constant -1.702000e+00 : f32
    %38 = vector.broadcast %cst_25 : f32 to vector<8x512xf32>
    %39 = arith.mulf %38, %37 : vector<8x512xf32>
    %40 = math.exp %39 : vector<8x512xf32>
    %cst_26 = arith.constant 1.000000e+00 : f32
    %41 = vector.broadcast %cst_26 : f32 to vector<8x512xf32>
    %42 = arith.addf %41, %40 : vector<8x512xf32>
    %cst_27 = arith.constant 1.000000e+00 : f32
    %43 = vector.broadcast %cst_27 : f32 to vector<8x512xf32>
    %44 = arith.divf %43, %42 : vector<8x512xf32>
    %45 = arith.mulf %37, %44 : vector<8x512xf32>
    %c0_28 = arith.constant 0 : index
    %c0_29 = arith.constant 0 : index
    %46 = vector.load %arg10[%c0_28, %c0_29] : memref<512x256xf32, #tpu.memory_space<vmem>>, vector<512x256xf32>
    %cst_30 = arith.constant dense<0.000000e+00> : vector<8x256xf32>
    %47 = tpu.matmul %45, %46, %cst_30 {dimension_numbers = #tpu.dot_dimension_numbers<[1], [0], [0], [1], [0, 0, 1, 1], [], []>} : vector<8x512xf32>, vector<512x256xf32>, vector<8x256xf32> -> vector<8x256xf32>
    %c0_31 = arith.constant 0 : index
    %c0_32 = arith.constant 0 : index
    %48 = vector.load %arg11[%c0_31, %c0_32] : memref<1x256xf32, #tpu.memory_space<vmem>>, vector<1x256xf32>
    %49 = vector.broadcast %48 : vector<1x256xf32> to vector<8x256xf32>
    %50 = arith.addf %47, %49 : vector<8x256xf32>
    %c0_33 = arith.constant 0 : index
    %c0_34 = arith.constant 0 : index
    %51 = vector.load %arg12[%c0_33, %c0_34] : memref<8x256xf32, #tpu.memory_space<vmem>>, vector<8x256xf32>
    tpu.vector_store %arg12[%c0_33, %c0_34], %50 {strides = array<i32>} : memref<8x256xf32, #tpu.memory_space<vmem>>, vector<8x256xf32>,
    return
  }
  func.func @transform_0(%arg0: i32) -> (i32, i32) {
    %c0_i32 = arith.constant 0 : i32
    %c0_i32_0 = arith.constant 0 : i32
    return %arg0, %c0_i32 : i32, i32
  }
  func.func @transform_1(%arg0: i32) -> (i32, i32) {
    %c0_i32 = arith.constant 0 : i32
    %c0_i32_0 = arith.constant 0 : i32
    %c0_i32_1 = arith.constant 0 : i32
    return %c0_i32, %c0_i32_0 : i32, i32
  }
  func.func @transform_2(%arg0: i32) -> (i32, i32) {
    %c0_i32 = arith.constant 0 : i32
    %c0_i32_0 = arith.constant 0 : i32
    %c0_i32_1 = arith.constant 0 : i32
    return %c0_i32, %c0_i32_0 : i32, i32
  }
  func.func @transform_3(%arg0: i32) -> (i32, i32) {
    %c0_i32 = arith.constant 0 : i32
    %c0_i32_0 = arith.constant 0 : i32
    %c0_i32_1 = arith.constant 0 : i32
    return %c0_i32, %c0_i32_0 : i32, i32
  }
  func.func @transform_4(%arg0: i32) -> (i32, i32) {
    %c0_i32 = arith.constant 0 : i32
    %c0_i32_0 = arith.constant 0 : i32
    %c0_i32_1 = arith.constant 0 : i32
    return %c0_i32, %c0_i32_0 : i32, i32
  }
  func.func @transform_5(%arg0: i32) -> (i32, i32) {
    %c0_i32 = arith.constant 0 : i32
    %c0_i32_0 = arith.constant 0 : i32
    %c0_i32_1 = arith.constant 0 : i32
    return %c0_i32, %c0_i32_0 : i32, i32
  }
  func.func @transform_6(%arg0: i32) -> (i32, i32) {
    %c0_i32 = arith.constant 0 : i32
    %c0_i32_0 = arith.constant 0 : i32
    %c0_i32_1 = arith.constant 0 : i32
    return %c0_i32, %c0_i32_0 : i32, i32
  }
  func.func @transform_7(%arg0: i32) -> (i32, i32) {
    %c0_i32 = arith.constant 0 : i32
    %c0_i32_0 = arith.constant 0 : i32
    %c0_i32_1 = arith.constant 0 : i32
    return %c0_i32, %c0_i32_0 : i32, i32
  }
  func.func @transform_8(%arg0: i32) -> (i32, i32) {
    %c0_i32 = arith.constant 0 : i32
    %c0_i32_0 = arith.constant 0 : i32
    %c0_i32_1 = arith.constant 0 : i32
    return %c0_i32, %c0_i32_0 : i32, i32
  }
  func.func @transform_9(%arg0: i32) -> (i32, i32) {
    %c0_i32 = arith.constant 0 : i32
    %c0_i32_0 = arith.constant 0 : i32
    %c0_i32_1 = arith.constant 0 : i32
    return %c0_i32, %c0_i32_0 : i32, i32
  }
  func.func @transform_10(%arg0: i32) -> (i32, i32) {
    %c0_i32 = arith.constant 0 : i32
    %c0_i32_0 = arith.constant 0 : i32
    %c0_i32_1 = arith.constant 0 : i32
    return %c0_i32, %c0_i32_0 : i32, i32
  }
  func.func @transform_11(%arg0: i32) -> (i32, i32) {
    %c0_i32 = arith.constant 0 : i32
    %c0_i32_0 = arith.constant 0 : i32
    return %arg0, %c0_i32 : i32, i32
  }
}

</mosaic_0001>

<bundles_post_ra>
// kernel: pretrain_forward.2
= control target key start
LH: loop header
LB: loop body
LE: loop exit
PB: predicated region body
PF: predicated region fallthrough
CT: control target
= control target key end

     0   :  { %10 = vsyncpa [#allocation3], 0  ;;  %s585_s15 = smov 0   ;;  %s670_s0 = inlined_call_operand.vmem [shape: f32[16,256], index: 0, kind: input, shape index: {}]   ;;  %s671_s1 = inlined_call_operand.hbm [shape: f32[256,128], index: 1, kind: input, shape index: {}]   ;;  %s672_s2 = inlined_call_operand.vmem [shape: f32[16,128], index: 2, kind: output, shape index: {0}]   ;;  %s673_s3 = inlined_call_operand.vmem [shape: f32[1,128], index: 3, kind: output, shape index: {1}]   ;;  %s674_s4 = inlined_call_operand.vmem [shape: f32[1,128], index: 4, kind: output, shape index: {2}]  }
   0x1 LB: > { %s591_s16 = sadd.s32 4294967295, %s554_s15   ;;  %p415_p0 = scmp.ge.s32.totalorder %s554_s15, 1  ;;  %s554_s15 = sphi %s585_s15, %s16_s15  }
   0x2   : > { %p136_p1 = scmp.lt.s32.totalorder %s554_s15, 3  ;;  %s556_s17 = smov [#allocation2]  }
   0x3   : > { %s148_s18 = sshll.u32 %s556_s17, 4  ;;  %p675_p4 = scmp.eq.s32.totalorder %s591_s16, 0  ;;  %s149_s18 = int_to_ptr.vmem [resolvable:$true] %s148_s18 }
   0x4   : > { %p596_p3 = pnand %p415_p0, %p136_p1  ;;  %s516_s23 = scalar_lea.hbm %s671_s1, 4096 }
   0x5   : > { %p517_p7 = scmp.ne.s32.totalorder %s671_s1, %s516_s23  ;;  %p523_p11 = scmp.lt.u32.totalorder %s516_s23, %s671_s1 }
   0x6   : > { %s677_s19 = scalar_select %p596_p3, 1, 0 }
   0x7   : > { %p498_p5 = pneg %p596_p3 }
   0x9   : > { %p605_p6 = pnand %p675_p4, %p498_p5 }
   0xb   : > { %p518_p8 = pneg %p605_p6 }
   0xd   : > { %p519_p9 = pnand %p518_p8, %p517_p7 }
   0xf   : > { %p520_p10 = pneg %p519_p9 }
  0x11   : > { %p525_p12 = pnand %p523_p11, %p520_p10 }
  0x13   : > { %528 = shalt.err (!%p525_p12)
}
  0x14   : > { %s529_s28 = scalar_lea.vmem %s149_s18, 4096  ;;  %p537_p5 = scmp.lt.s32.totalorder %s149_s18, %s149_s18 }
  0x15   : > { %p530_p13 = scmp.ne.s32.totalorder %s149_s18, %s529_s28  ;;  %p538_p2 = scmp.lt.s32.totalorder %s529_s28, %s529_s28 }
  0x17   : > { %p532_p0 = pnand %p530_p13, %p518_p8  ;;  %p539_p4 = por %p538_p2, %p537_p5 }
  0x19   : > { %p533_p1 = pneg %p532_p0 }
  0x1b   : > { %p540_p3 = pnand %p539_p4, %p533_p1 }
  0x1d   : > { %543 = shalt.err (!%p540_p3)
}
  0x1e   : > { %s557_s29 = smov 128   ;;  %s558_s30 = smov 8  }
  0x1f   : > { %501 = dma.hbm_to_vmem [thread:$0]  (!%p605_p6), %s671_s1, 4096, %s149_s18, [#allocation3], %s557_s29, %s557_s29, %s558_s30  }
  0x20   : > { %p679_p7 = scmp.ne.s32.totalorder %s677_s19, 0 }
  0x21   : > { %p680_p9 = scmp.eq.s32.totalorder (!%p679_p7), %s591_s16, 0 }
  0x22   : > { %172 = sbr.rel (%p679_p7) target bundleno = 310 (0x136), region = 28 }
  0x29   : > { %549 = dma.done.wait (%p680_p9), [#allocation3], 4096   ;;  %p681_p8 = pmov %p680_p9 }
  0x2a   : > { %p197_p2 = scmp.lt.s32.totalorder %s591_s16, 1  ;;  %v224_v0 = vld [vmem:[#allocation2 + $0x80] sm:$0xff]  ;;  %v225_v1 = vld [vmem:[#allocation2 + $0x88] sm:$0xff]  ;;  %v226_v5 = vld [vmem:[#allocation2 + $0x90] sm:$0xff]  ;;  %p682_p3 = scmp.ne.s32.totalorder %s591_s16, 0 }
  0x2b   : > { %551 = vsyncadd (%p681_p8), [#allocation3], 4294963200  ;;  %v208_v2 = vld [vmem:[#allocation2] sm:$0xff]  ;;  %v462_v3 = vpack.c.bf16 %v225_v1, %v224_v0  ;;  %v209_v4 = vld [vmem:[#allocation2 + $0x8] sm:$0xff]  ;;  %v559_v53 = vmov (!%p682_p3), 0.0  }
  0x2c   : > { %s633_s7 = scalar_select %p197_p2, %s591_s16, 1  ;;  %v227_v6 = vld [vmem:[#allocation2 + $0x98] sm:$0xff]  ;;  %v464_v7 = vpack.c.bf16 %v209_v4, %v208_v2  ;;  %v210_v9 = vld [vmem:[#allocation2 + $0x10] sm:$0xff]  ;;  %v228_v11 = vld [vmem:[#allocation2 + $0xa0] sm:$0xff] }
  0x2d   : > { %v466_v8 = vpack.c.bf16 %v227_v6, %v226_v5  ;;  %v211_v10 = vld [vmem:[#allocation2 + $0x18] sm:$0xff]  ;;  %463 = vmatprep.subr.bf16.mxu0 %v462_v3  ;;  %v229_v12 = vld [vmem:[#allocation2 + $0xa8] sm:$0xff]  ;;  %v212_v15 = vld [vmem:[#allocation2 + $0x20] sm:$0xff]  ;;  %315 = vst [vmem:[%s673_s3] sm:$0x1] (!%p682_p3), %v559_v53 }
  0x2e   : > { %465 = vmatpush3.bf16.msra.mxu0 %v464_v7  ;;  %v468_v13 = vpack.c.bf16 %v211_v10, %v210_v9  ;;  %s426_s8 = sshll.u32 %s633_s7, 4  ;;  %v470_v14 = vpack.c.bf16 %v229_v12, %v228_v11  ;;  %v213_v16 = vld [vmem:[#allocation2 + $0x28] sm:$0xff]  ;;  %v230_v17 = vld [vmem:[#allocation2 + $0xb0] sm:$0xff]  ;;  %v231_v18 = vld [vmem:[#allocation2 + $0xb8] sm:$0xff]  ;;  %s422_s12 = sshll.u32 %s633_s7, 3  ;;  %316 = vst [vmem:[%s674_s4] sm:$0x1] (!%p682_p3), %v559_v53 }
  0x2f   : > { %467 = vmatprep.subr.bf16.mxu0 %v466_v8  ;;  %s639_s11 = scalar_lea.vmem %s670_s0, %s426_s8  ;;  %v472_v19 = vpack.c.bf16 %v213_v16, %v212_v15  ;;  %v474_v20 = vpack.c.bf16 %v231_v18, %v230_v17  ;;  %v214_v21 = vld [vmem:[#allocation2 + $0x30] sm:$0xff]  ;;  %v215_v22 = vld [vmem:[#allocation2 + $0x38] sm:$0xff]  ;;  %v232_v23 = vld [vmem:[#allocation2 + $0xc0] sm:$0xff]  ;;  %s205_s17 = scalar_lea.vmem %s672_s2, %s422_s12 }
  0x30   : > { %v233_v24 = vld [vmem:[#allocation2 + $0xc8] sm:$0xff]  ;;  %v476_v26 = vpack.c.bf16 %v215_v22, %v214_v21  ;;  %v216_v28 = vld [vmem:[#allocation2 + $0x40] sm:$0xff]  ;;  %v234_v30 = vld [vmem:[#allocation2 + $0xd0] sm:$0xff] }
  0x31   : > { %v207_v25 = vld [vmem:[%s639_s11 + $0x8] sm:$0xff]  ;;  %v478_v27 = vpack.c.bf16 %v233_v24, %v232_v23  ;;  %v235_v31 = vld [vmem:[#allocation2 + $0xd8] sm:$0xff]  ;;  %v218_v34 = vld [vmem:[#allocation2 + $0x50] sm:$0xff] }
  0x32   : > { %469 = vmatpush3.bf16.msra.mxu0 %v468_v13  ;;  %304 = vmatprep.mubr.f32.mxu0 %v207_v25  ;;  %v217_v29 = vld [vmem:[#allocation2 + $0x48] sm:$0xff]  ;;  %v482_v33 = vpack.c.bf16 %v235_v31, %v234_v30  ;;  %v219_v35 = vld [vmem:[#allocation2 + $0x58] sm:$0xff]  ;;  %v236_v36 = vld [vmem:[#allocation2 + $0xe0] sm:$0xff] }
  0x33   : > { %471 = vmatprep.subr.bf16.mxu0 %v470_v14  ;;  %v480_v32 = vpack.c.bf16 %v217_v29, %v216_v28  ;;  %v237_v37 = vld [vmem:[#allocation2 + $0xe8] sm:$0xff]  ;;  %v484_v38 = vpack.c.bf16 %v219_v35, %v218_v34  ;;  %v220_v40 = vld [vmem:[#allocation2 + $0x60] sm:$0xff]  ;;  %v238_v42 = vld [vmem:[#allocation2 + $0xf0] sm:$0xff] }
  0x34   : > { %v486_v39 = vpack.c.bf16 %v237_v37, %v236_v36  ;;  %v221_v41 = vld [vmem:[#allocation2 + $0x68] sm:$0xff]  ;;  %v239_v43 = vld [vmem:[#allocation2 + $0xf8] sm:$0xff]  ;;  %v222_v46 = vld [vmem:[#allocation2 + $0x70] sm:$0xff] }
  0x35   : > { %v488_v44 = vpack.c.bf16 %v221_v41, %v220_v40  ;;  %v490_v45 = vpack.c.bf16 %v239_v43, %v238_v42  ;;  %v223_v47 = vld [vmem:[#allocation2 + $0x78] sm:$0xff]  ;;  %v206_v49 = vld [vmem:[%s639_s11] sm:$0xff] }
  0x36   : > { %473 = vmatpush3.bf16.msra.mxu0 %v472_v19  ;;  %v492_v48 = vpack.c.bf16 %v223_v47, %v222_v46 }
  0x37   : > { %475 = vmatprep.subr.bf16.mxu0 %v474_v20 }
  0x3a   : > { %477 = vmatpush3.bf16.msra.mxu0 %v476_v26 }
  0x3b   : > { %479 = vmatprep.subr.bf16.mxu0 %v478_v27 }
  0x3e   : > { %481 = vmatpush3.bf16.msra.mxu0 %v480_v32 }
  0x3f   : > { %483 = vmatprep.subr.bf16.mxu0 %v482_v33 }
  0x42   : > { %485 = vmatpush3.bf16.msra.mxu0 %v484_v38 }
  0x43   : > { %487 = vmatprep.subr.bf16.mxu0 %v486_v39 }
  0x46   : > { %489 = vmatpush3.bf16.msra.mxu0 %v488_v44 }
  0x47   : > { %491 = vmatprep.subr.bf16.mxu0 %v490_v45 }
  0x4a   : > { %493 = vmatpush3.bf16.msra.mxu0 %v492_v48 }
  0x4d   : > { %305 = vmatmul.mubr.f32.vlgmr.msra.gmra.mrb[0].mxu0 %v206_v49 }
 0x11e   : > { %314 = sbr.rel (%p682_p3) target bundleno = 293 (0x125), region = 36 }
 0x120   : > { %v459_v50 = vpop.f32.mrb[0].mxu0 }
 0x121   : > { %v460_v51 = vpop.f32.mrb[1].mxu0 }
 0x122   : > { %v461_v52 = vadd.f32 %v460_v51, %v459_v50 }
 0x124   : > { %310 = vst [vmem:[%s205_s17] sm:$0xff] %v461_v52 }
 0x125 PF: > { %v318_v54 = vrot.slane %v461_v52, 4  ;;  %v327_v55 = vmul.f32 %v461_v52, %v461_v52  ;;  %v317_v0 = vld [vmem:[%s673_s3] sm:$0x1] }
 0x126   : > { %v326_v3 = vld [vmem:[%s674_s4] sm:$0x1] }
 0x127   : > { %v319_v56 = vadd.f32 %v461_v52, %v318_v54  ;;  %v328_v57 = vrot.slane %v327_v55, 4 }
 0x129   : > { %v320_v58 = vrot.slane %v319_v56, 2  ;;  %v329_v59 = vadd.f32 %v328_v57, %v327_v55 }
 0x12b   : > { %v321_v60 = vadd.f32 %v320_v58, %v319_v56  ;;  %v330_v61 = vrot.slane %v329_v59, 2 }
 0x12d   : > { %v322_v62 = vrot.slane %v321_v60, 1  ;;  %v331_v63 = vadd.f32 %v330_v61, %v329_v59 }
 0x12f   : > { %v323_v1 = vadd.f32 %v322_v62, %v321_v60  ;;  %v332_v2 = vrot.slane %v331_v63, 1 }
 0x131   : > { %v324_v4 = vadd.f32 %v323_v1, %v317_v0  ;;  %v333_v5 = vadd.f32 %v332_v2, %v331_v63 }
 0x133   : > { %325 = vst [vmem:[%s673_s3] sm:$0x1] %v324_v4  ;;  %v334_v6 = vadd.f32 %v333_v5, %v326_v3 }
 0x135   : > { %335 = vst [vmem:[%s674_s4] sm:$0x1] %v334_v6 }
 0x136 PF: > { %s16_s15 = sadd.s32 1, %s554_s15  }
 0x137   : > { %p13_p4 = scmp.ge.s32.totalorder %s16_s15, 4  }
 0x139   :  { %15 = sbr.rel (!%p13_p4) target bundleno = 1 (0x1), region = 83 }
 0x140   :  { %367 = vsyncpa [#allocation3], 1 }
 0x141   :  { %369 = vsyncpa [#allocation3 + $0x1], 1 }

// kernel: pretrain_forward.3
= control target key start
LH: loop header
LB: loop body
LE: loop exit
PB: predicated region body
PF: predicated region fallthrough
CT: control target
= control target key end

     0   :  { %16 = vsyncpa [#allocation3], 0  ;;  %s1858_s17 = smov 0   ;;  %s2498_s0 = inlined_call_operand.vmem [shape: f32[16,128], index: 0, kind: input, shape index: {}]   ;;  %s2499_s1 = inlined_call_operand.vmem [shape: f32[1,128], index: 1, kind: input, shape index: {}]   ;;  %s2500_s2 = inlined_call_operand.vmem [shape: f32[1,128], index: 2, kind: input, shape index: {}]   ;;  %s2501_s3 = inlined_call_operand.vmem [shape: f32[128,128], index: 3, kind: input, shape index: {}]   ;;  %s2502_s4 = inlined_call_operand.vmem [shape: f32[1,128], index: 4, kind: input, shape index: {}]   ;;  %s2503_s5 = inlined_call_operand.vmem [shape: f32[128,256], index: 5, kind: input, shape index: {}]   ;;  %s2504_s6 = inlined_call_operand.vmem [shape: f32[1,256], index: 6, kind: input, shape index: {}]   ;;  %s2505_s7 = inlined_call_operand.vmem [shape: f32[256,512], index: 7, kind: input, shape index: {}]   ;;  %s2506_s8 = inlined_call_operand.vmem [shape: f32[1,512], index: 8, kind: input, shape index: {}]   ;;  %s2507_s9 = inlined_call_operand.hbm [shape: f32[512,256], index: 9, kind: input, shape index: {}]   ;;  %s2508_s10 = inlined_call_operand.vmem [shape: f32[1,256], index: 10, kind: input, shape index: {}]   ;;  %s2509_s11 = inlined_call_operand.vmem [shape: f32[16,256], index: 11, kind: output, shape index: {}]  }
   0x1 LB: > { %s1864_s18 = sadd.s32 4294967295, %s1790_s17   ;;  %p1318_p0 = scmp.ge.s32.totalorder %s1790_s17, 1  ;;  %s1790_s17 = sphi %s1858_s17, %s22_s17  }
   0x2   : > { %p289_p1 = scmp.lt.s32.totalorder %s1790_s17, 3  ;;  %s1792_s19 = smov [#allocation2]  }
   0x3   : > { %s325_s20 = sshll.u32 %s1792_s19, 4  ;;  %p2510_p3 = scmp.eq.s32.totalorder %s1864_s18, 0  ;;  %s326_s20 = int_to_ptr.vmem [resolvable:$true] %s325_s20 }
   0x4   : > { %p1868_p2 = pnand %p1318_p0, %p289_p1  ;;  %s1752_s25 = scalar_lea.hbm %s2507_s9, 16384 }
   0x5   : > { %p1753_p6 = scmp.ne.s32.totalorder %s2507_s9, %s1752_s25  ;;  %p1759_p10 = scmp.lt.u32.totalorder %s1752_s25, %s2507_s9 }
   0x6   : > { %s2512_s21 = scalar_select %p1868_p2, 1, 0 }
   0x7   : > { %p1704_p4 = pneg %p1868_p2 }
   0x9   : > { %p1877_p5 = pnand %p2510_p3, %p1704_p4 }
   0xb   : > { %p1754_p7 = pneg %p1877_p5 }
   0xd   : > { %p1755_p8 = pnand %p1754_p7, %p1753_p6 }
   0xf   : > { %p1756_p9 = pneg %p1755_p8 }
  0x11   : > { %p1761_p11 = pnand %p1759_p10, %p1756_p9 }
  0x13   : > { %1764 = shalt.err (!%p1761_p11)
}
  0x14   : > { %s1765_s30 = scalar_lea.vmem %s326_s20, 16384  ;;  %p1773_p1 = scmp.lt.s32.totalorder %s326_s20, %s326_s20 }
  0x15   : > { %p1766_p12 = scmp.ne.s32.totalorder %s326_s20, %s1765_s30  ;;  %p1774_p4 = scmp.lt.s32.totalorder %s1765_s30, %s1765_s30 }
  0x17   : > { %p1768_p13 = pnand %p1766_p12, %p1754_p7  ;;  %p1775_p3 = por %p1774_p4, %p1773_p1 }
  0x19   : > { %p1769_p0 = pneg %p1768_p13 }
  0x1b   : > { %p1776_p2 = pnand %p1775_p3, %p1769_p0 }
  0x1d   : > { %1779 = shalt.err (!%p1776_p2)
}
  0x1e   : > { %s1793_s12 = smov 256   ;;  %s1794_s13 = smov 16  }
  0x1f   : > { %1707 = dma.hbm_to_vmem [thread:$0]  (!%p1877_p5), %s2507_s9, 16384, %s326_s20, [#allocation3], %s1793_s12, %s1793_s12, %s1794_s13  }
  0x20   : > { %p2514_p6 = scmp.ne.s32.totalorder %s2512_s21, 0 }
  0x21   : > { %p2515_p8 = scmp.eq.s32.totalorder (!%p2514_p6), %s1864_s18, 0 }
  0x22   : > { %351 = sbr.rel (%p2514_p6) target bundleno = 1092 (0x444), region = 64 }
  0x29   : > { %1785 = dma.done.wait (%p2515_p8), [#allocation3], 16384   ;;  %p2516_p7 = pmov %p2515_p8 }
  0x2a   : > { %v1795_v0 = vmov 0.0|0.0   ;;  %vm1796_vm0 = vmmov 0   ;;  %v1797_v1 = vmov 0.0   ;;  %v416_v2 = vld [vmem:[%s2501_s3] sm:$0xff]  ;;  %v417_v3 = vld [vmem:[%s2501_s3 + $0x8] sm:$0xff]  ;;  %v418_v4 = vld [vmem:[%s2501_s3 + $0x10] sm:$0xff] }
  0x2b   : > { %1787 = vsyncadd (%p2516_p7), [#allocation3], 4294950912  ;;  %1384 = vmatprep.subr.bf16.mxu0 %v1795_v0  ;;  %1381 = vmatprep.mubr.msk.f32.mxu0 %vm1796_vm0, %v1797_v1  ;;  %v1385_v5 = vpack.c.bf16 %v417_v3, %v416_v2  ;;  %v419_v6 = vld [vmem:[%s2501_s3 + $0x18] sm:$0xff]  ;;  %v420_v8 = vld [vmem:[%s2501_s3 + $0x20] sm:$0xff]  ;;  %p390_p2 = scmp.lt.s32.totalorder %s1864_s18, 1 }
  0x2c   : > { %624 = vmatprep.mubr.f32.mxu1 %v1797_v1  ;;  %v1388_v7 = vpack.c.bf16 %v419_v6, %v418_v4  ;;  %v421_v9 = vld [vmem:[%s2501_s3 + $0x28] sm:$0xff]  ;;  %v422_v11 = vld [vmem:[%s2501_s3 + $0x30] sm:$0xff]  ;;  %v423_v12 = vld [vmem:[%s2501_s3 + $0x38] sm:$0xff] }
  0x2d   : > { %1386 = vmatpush3.bf16.msra.mxu0 %v1385_v5  ;;  %v1391_v10 = vpack.c.bf16 %v421_v9, %v420_v8  ;;  %v1394_v13 = vpack.c.bf16 %v423_v12, %v422_v11  ;;  %v424_v14 = vld [vmem:[%s2501_s3 + $0x40] sm:$0xff]  ;;  %v425_v15 = vld [vmem:[%s2501_s3 + $0x48] sm:$0xff]  ;;  %s2518_s18 = smov (!%p390_p2, %s1864_s18), 1  ;;  %v426_v17 = vld [vmem:[%s2501_s3 + $0x50] sm:$0xff] }
  0x2e   : > { %1387 = vmatprep.subr.bf16.mxu0 %v1795_v0  ;;  %v1397_v16 = vpack.c.bf16 %v425_v15, %v424_v14  ;;  %v427_v18 = vld [vmem:[%s2501_s3 + $0x58] sm:$0xff]  ;;  %s1323_s25 = sshll.u32 %s2518_s18, 3  ;;  %v428_v20 = vld [vmem:[%s2501_s3 + $0x60] sm:$0xff]  ;;  %v429_v21 = vld [vmem:[%s2501_s3 + $0x68] sm:$0xff]  ;;  %s1331_s29 = sshll.u32 %s2518_s18, 4 }
  0x2f   : > { %v1400_v19 = vpack.c.bf16 %v427_v18, %v426_v17  ;;  %s393_s13 = scalar_lea.vmem %s2498_s0, %s1323_s25  ;;  %v1403_v22 = vpack.c.bf16 %v429_v21, %v428_v20  ;;  %v1326_v24 = vld [vmem:[%s2499_s1] ss:$0 sm:$0xff]  ;;  %v430_v25 = vld [vmem:[%s2501_s3 + $0x70] sm:$0xff]  ;;  %v431_v26 = vld [vmem:[%s2501_s3 + $0x78] sm:$0xff] }
  0x30   : > { %v399_v23 = vld [vmem:[%s393_s13] sm:$0xff]  ;;  %v1406_v28 = vpack.c.bf16 %v431_v26, %v430_v25  ;;  %v517_v31 = vld [vmem:[%s2503_s5 + $0x8] sm:$0xff]  ;;  %v519_v32 = vld [vmem:[%s2503_s5 + $0x18] sm:$0xff]  ;;  %s398_s13 = scalar_lea.vmem %s2509_s11, %s1331_s29 }
  0x31   : > { %1389 = vmatpush3.bf16.msra.mxu0 %v1388_v7  ;;  %v407_v27 = vmul.f32 %v1326_v24, %v399_v23  ;;  %v1327_v29 = vld [vmem:[%s2500_s2] ss:$0 sm:$0xff]  ;;  %v1408_v33 = vpack.c.bf16 %v519_v32, %v517_v31  ;;  %v518_v35 = vld [vmem:[%s2503_s5 + $0x10] sm:$0xff]  ;;  %v521_v37 = vld [vmem:[%s2503_s5 + $0x28] sm:$0xff] }
  0x32   : > { %1390 = vmatprep.subr.bf16.mxu0 %v1795_v0  ;;  %v516_v34 = vld [vmem:[%s2503_s5] sm:$0xff]  ;;  %v523_v38 = vld [vmem:[%s2503_s5 + $0x38] sm:$0xff]  ;;  %v522_v41 = vld [vmem:[%s2503_s5 + $0x30] sm:$0xff] }
  0x33   : > { %v415_v30 = vadd.f32 %v1327_v29, %v407_v27  ;;  %v1410_v36 = vpack.c.bf16 %v518_v35, %v516_v34  ;;  %1409 = vmatprep.subr.bf16.mxu1 %v1408_v33  ;;  %v1412_v39 = vpack.c.bf16 %v523_v38, %v521_v37  ;;  %v520_v40 = vld [vmem:[%s2503_s5 + $0x20] sm:$0xff]  ;;  %v525_v43 = vld [vmem:[%s2503_s5 + $0x48] sm:$0xff]  ;;  %v527_v44 = vld [vmem:[%s2503_s5 + $0x58] sm:$0xff] }
  0x34   : > { %v1414_v42 = vpack.c.bf16 %v522_v41, %v520_v40  ;;  %v1416_v45 = vpack.c.bf16 %v527_v44, %v525_v43  ;;  %v524_v46 = vld [vmem:[%s2503_s5 + $0x40] sm:$0xff]  ;;  %v526_v47 = vld [vmem:[%s2503_s5 + $0x50] sm:$0xff]  ;;  %v529_v49 = vld [vmem:[%s2503_s5 + $0x68] sm:$0xff] }
  0x35   : > { %1392 = vmatpush3.bf16.msra.mxu0 %v1391_v10  ;;  %1411 = vmatpush1.bf16.msra.mxu1 %v1410_v36  ;;  %v1418_v48 = vpack.c.bf16 %v526_v47, %v524_v46  ;;  %v531_v50 = vld [vmem:[%s2503_s5 + $0x78] sm:$0xff]  ;;  %v528_v52 = vld [vmem:[%s2503_s5 + $0x60] sm:$0xff]  ;;  %v530_v53 = vld [vmem:[%s2503_s5 + $0x70] sm:$0xff] }
  0x36   : > { %1393 = vmatprep.subr.bf16.mxu0 %v1795_v0  ;;  %1413 = vmatprep.subr.bf16.mxu1 %v1412_v39  ;;  %v1420_v51 = vpack.c.bf16 %v531_v50, %v529_v49  ;;  %v1422_v54 = vpack.c.bf16 %v530_v53, %v528_v52  ;;  %v533_v55 = vld [vmem:[%s2503_s5 + $0x88] sm:$0xff]  ;;  %v535_v56 = vld [vmem:[%s2503_s5 + $0x98] sm:$0xff]  ;;  %v532_v58 = vld [vmem:[%s2503_s5 + $0x80] sm:$0xff] }
  0x37   : > { %v1424_v57 = vpack.c.bf16 %v535_v56, %v533_v55  ;;  %v534_v59 = vld [vmem:[%s2503_s5 + $0x90] sm:$0xff]  ;;  %v537_v61 = vld [vmem:[%s2503_s5 + $0xa8] sm:$0xff]  ;;  %v539_v62 = vld [vmem:[%s2503_s5 + $0xb8] sm:$0xff] }
  0x38   : > { %v1426_v60 = vpack.c.bf16 %v534_v59, %v532_v58  ;;  %v1428_v63 = vpack.c.bf16 %v539_v62, %v537_v61  ;;  %v538_v1 = vld [vmem:[%s2503_s5 + $0xb0] sm:$0xff]  ;;  %v541_v3 = vld [vmem:[%s2503_s5 + $0xc8] sm:$0xff]  ;;  %v543_v4 = vld [vmem:[%s2503_s5 + $0xd8] sm:$0xff] }
  0x39   : > { %1395 = vmatpush3.bf16.msra.mxu0 %v1394_v13  ;;  %1415 = vmatpush1.bf16.msra.mxu1 %v1414_v42  ;;  %v1432_v5 = vpack.c.bf16 %v543_v4, %v541_v3  ;;  %v540_v6 = vld [vmem:[%s2503_s5 + $0xc0] sm:$0xff]  ;;  %v542_v7 = vld [vmem:[%s2503_s5 + $0xd0] sm:$0xff]  ;;  %v545_v9 = vld [vmem:[%s2503_s5 + $0xe8] sm:$0xff] }
  0x3a   : > { %1396 = vmatprep.subr.bf16.mxu0 %v1795_v0  ;;  %1417 = vmatprep.subr.bf16.mxu1 %v1416_v45  ;;  %v1434_v8 = vpack.c.bf16 %v542_v7, %v540_v6  ;;  %v547_v10 = vld [vmem:[%s2503_s5 + $0xf8] sm:$0xff]  ;;  %v544_v12 = vld [vmem:[%s2503_s5 + $0xe0] sm:$0xff]  ;;  %v546_v13 = vld [vmem:[%s2503_s5 + $0xf0] sm:$0xff] }
  0x3b   : > { %v1436_v11 = vpack.c.bf16 %v547_v10, %v545_v9  ;;  %v1438_v14 = vpack.c.bf16 %v546_v13, %v544_v12  ;;  %v646_v15 = vld [vmem:[%s2505_s7 + $0x8] sm:$0xff]  ;;  %v1328_v18 = vld [vmem:[%s2502_s4] ss:$0 sm:$0xff] }
  0x3c   : > { %v645_v26 = vld [vmem:[%s2505_s7] sm:$0xff]  ;;  %v658_v29 = vld [vmem:[%s2505_s7 + $0x68] sm:$0xff] }
  0x3d   : > { %1398 = vmatpush3.bf16.msra.mxu0 %v1397_v16  ;;  %1419 = vmatpush1.bf16.msra.mxu1 %v1418_v48  ;;  %v650_v16 = vld [vmem:[%s2505_s7 + $0x28] sm:$0xff]  ;;  %v649_v27 = vld [vmem:[%s2505_s7 + $0x20] sm:$0xff] }
  0x3e   : > { %1399 = vmatprep.subr.bf16.mxu0 %v1795_v0  ;;  %1421 = vmatprep.subr.bf16.mxu1 %v1420_v51  ;;  %v1440_v17 = vpack.c.bf16 %v650_v16, %v646_v15  ;;  %v1442_v31 = vpack.c.bf16 %v649_v27, %v645_v26  ;;  %v653_v34 = vld [vmem:[%s2505_s7 + $0x40] sm:$0xff]  ;;  %v662_v36 = vld [vmem:[%s2505_s7 + $0x88] sm:$0xff] }
  0x3f   : > { %v657_v35 = vld [vmem:[%s2505_s7 + $0x60] sm:$0xff]  ;;  %v666_v37 = vld [vmem:[%s2505_s7 + $0xa8] sm:$0xff] }
  0x40   : > { %v1446_v38 = vpack.c.bf16 %v657_v35, %v653_v34  ;;  %v1448_v39 = vpack.c.bf16 %v666_v37, %v662_v36  ;;  %v661_v40 = vld [vmem:[%s2505_s7 + $0x80] sm:$0xff]  ;;  %v670_v42 = vld [vmem:[%s2505_s7 + $0xc8] sm:$0xff] }
  0x41   : > { %1401 = vmatpush3.bf16.msra.mxu0 %v1400_v19  ;;  %1423 = vmatpush1.bf16.msra.mxu1 %v1422_v54  ;;  %v665_v41 = vld [vmem:[%s2505_s7 + $0xa0] sm:$0xff]  ;;  %v674_v43 = vld [vmem:[%s2505_s7 + $0xe8] sm:$0xff] }
  0x42   : > { %1402 = vmatprep.subr.bf16.mxu0 %v1795_v0  ;;  %1425 = vmatprep.subr.bf16.mxu1 %v1424_v57  ;;  %v1450_v44 = vpack.c.bf16 %v665_v41, %v661_v40  ;;  %v1452_v45 = vpack.c.bf16 %v674_v43, %v670_v42  ;;  %v669_v46 = vld [vmem:[%s2505_s7 + $0xc0] sm:$0xff]  ;;  %v678_v48 = vld [vmem:[%s2505_s7 + $0x108] sm:$0xff] }
  0x43   : > { %v673_v47 = vld [vmem:[%s2505_s7 + $0xe0] sm:$0xff]  ;;  %v682_v49 = vld [vmem:[%s2505_s7 + $0x128] sm:$0xff] }
  0x44   : > { %v1454_v50 = vpack.c.bf16 %v673_v47, %v669_v46  ;;  %v1456_v51 = vpack.c.bf16 %v682_v49, %v678_v48  ;;  %v677_v52 = vld [vmem:[%s2505_s7 + $0x100] sm:$0xff]  ;;  %v686_v54 = vld [vmem:[%s2505_s7 + $0x148] sm:$0xff] }
  0x45   : > { %1404 = vmatpush3.bf16.msra.mxu0 %v1403_v22  ;;  %1427 = vmatpush1.bf16.msra.mxu1 %v1426_v60  ;;  %v681_v53 = vld [vmem:[%s2505_s7 + $0x120] sm:$0xff]  ;;  %v690_v55 = vld [vmem:[%s2505_s7 + $0x168] sm:$0xff] }
  0x46   : > { %1405 = vmatprep.subr.bf16.mxu0 %v1795_v0  ;;  %v536_v0 = vld [vmem:[%s2503_s5 + $0xa0] sm:$0xff]  ;;  %1429 = vmatprep.subr.bf16.mxu1 %v1428_v63  ;;  %v1458_v56 = vpack.c.bf16 %v681_v53, %v677_v52  ;;  %v1460_v57 = vpack.c.bf16 %v690_v55, %v686_v54  ;;  %v694_v60 = vld [vmem:[%s2505_s7 + $0x188] sm:$0xff] }
  0x47   : > { %v1430_v2 = vpack.c.bf16 %v538_v1, %v536_v0  ;;  %v685_v58 = vld [vmem:[%s2505_s7 + $0x140] sm:$0xff]  ;;  %v698_v61 = vld [vmem:[%s2505_s7 + $0x1a8] sm:$0xff] }
  0x48   : > { %v689_v59 = vld [vmem:[%s2505_s7 + $0x160] sm:$0xff]  ;;  %v1464_v63 = vpack.c.bf16 %v698_v61, %v694_v60  ;;  %v706_v3 = vld [vmem:[%s2505_s7 + $0x1e8] sm:$0xff]  ;;  %v968_v61 = vld [vmem:[#allocation2 + $0x18] sm:$0xff] }
  0x49   : > { %1407 = vmatpush3.bf16.msra.mxu0 %v1406_v28  ;;  %1431 = vmatpush1.bf16.msra.mxu1 %v1430_v2  ;;  %v654_v28 = vld [vmem:[%s2505_s7 + $0x48] sm:$0xff]  ;;  %v1462_v62 = vpack.c.bf16 %v689_v59, %v685_v58  ;;  %v693_v0 = vld [vmem:[%s2505_s7 + $0x180] sm:$0xff]  ;;  %v652_v58 = vld [vmem:[%s2505_s7 + $0x38] sm:$0xff] }
  0x4a   : > { %1433 = vmatprep.subr.bf16.mxu1 %v1432_v5  ;;  %v1444_v33 = vpack.c.bf16 %v658_v29, %v654_v28  ;;  %v697_v1 = vld [vmem:[%s2505_s7 + $0x1a0] sm:$0xff]  ;;  %v702_v2 = vld [vmem:[%s2505_s7 + $0x1c8] sm:$0xff] }
  0x4b   : > { %v1466_v4 = vpack.c.bf16 %v697_v1, %v693_v0  ;;  %v1468_v5 = vpack.c.bf16 %v706_v3, %v702_v2  ;;  %v701_v6 = vld [vmem:[%s2505_s7 + $0x1c0] sm:$0xff]  ;;  %v710_v9 = vld [vmem:[%s2505_s7 + $0x208] sm:$0xff]  ;;  %v967_v0 = vld [vmem:[#allocation2 + $0x10] sm:$0xff] }
  0x4c   : > { %1382 = vmatmul.mubr.f32.vlgmr.msra.gmra.mrb[0].mxu0 %v415_v30  ;;  %v705_v7 = vld [vmem:[%s2505_s7 + $0x1e0] sm:$0xff]  ;;  %v714_v10 = vld [vmem:[%s2505_s7 + $0x228] sm:$0xff]  ;;  %v972_v2 = vld [vmem:[#allocation2 + $0x38] sm:$0xff] }
  0x4d   : > { %1435 = vmatpush1.bf16.msra.mxu1 %v1434_v8  ;;  %v1470_v8 = vpack.c.bf16 %v705_v7, %v701_v6  ;;  %v709_v12 = vld [vmem:[%s2505_s7 + $0x200] sm:$0xff]  ;;  %v718_v15 = vld [vmem:[%s2505_s7 + $0x248] sm:$0xff]  ;;  %v971_v6 = vld [vmem:[#allocation2 + $0x30] sm:$0xff] }
  0x4e   : > { %1437 = vmatprep.subr.bf16.mxu1 %v1436_v11  ;;  %v1472_v11 = vpack.c.bf16 %v714_v10, %v710_v9  ;;  %v713_v13 = vld [vmem:[%s2505_s7 + $0x220] sm:$0xff]  ;;  %v722_v16 = vld [vmem:[%s2505_s7 + $0x268] sm:$0xff] }
  0x4f   : > { %v734_v27 = vld [vmem:[%s2505_s7 + $0x2c8] sm:$0xff]  ;;  %v741_v36 = vld [vmem:[%s2505_s7 + $0x300] sm:$0xff] }
  0x50   : > { %v738_v28 = vld [vmem:[%s2505_s7 + $0x2e8] sm:$0xff]  ;;  %v745_v37 = vld [vmem:[%s2505_s7 + $0x320] sm:$0xff] }
  0x51   : > { %1439 = vmatpush1.bf16.msra.mxu1 %v1438_v14  ;;  %v1474_v14 = vpack.c.bf16 %v713_v13, %v709_v12  ;;  %v1484_v29 = vpack.c.bf16 %v738_v28, %v734_v27  ;;  %v746_v34 = vld [vmem:[%s2505_s7 + $0x328] sm:$0xff]  ;;  %v749_v42 = vld [vmem:[%s2505_s7 + $0x340] sm:$0xff]  ;;  %v975_v12 = vld [vmem:[#allocation2 + $0x50] sm:$0xff] }
  0x52   : > { %1441 = vmatprep.subr.bf16.mxu1 %v1440_v17  ;;  %v1476_v17 = vpack.c.bf16 %v722_v16, %v718_v15  ;;  %v754_v40 = vld [vmem:[%s2505_s7 + $0x368] sm:$0xff]  ;;  %v753_v43 = vld [vmem:[%s2505_s7 + $0x360] sm:$0xff]  ;;  %v988_v27 = vld [vmem:[#allocation2 + $0xb8] sm:$0xff] }
  0x53   : > { %v762_v46 = vld [vmem:[%s2505_s7 + $0x3a8] sm:$0xff]  ;;  %v757_v48 = vld [vmem:[%s2505_s7 + $0x380] sm:$0xff] }
  0x54   : > { %v761_v49 = vld [vmem:[%s2505_s7 + $0x3a0] sm:$0xff]  ;;  %v770_v52 = vld [vmem:[%s2505_s7 + $0x3e8] sm:$0xff] }
  0x55   : > { %v765_v54 = vld [vmem:[%s2505_s7 + $0x3c0] sm:$0xff]  ;;  %v966_v60 = vld [vmem:[#allocation2 + $0x8] sm:$0xff] }
  0x56   : > { %v769_v55 = vld [vmem:[%s2505_s7 + $0x3e0] sm:$0xff]  ;;  %v970_v1 = vld [vmem:[#allocation2 + $0x28] sm:$0xff] }
  0x57   : > { %v974_v7 = vld [vmem:[#allocation2 + $0x48] sm:$0xff] }
  0x58   : > { %v978_v13 = vld [vmem:[#allocation2 + $0x68] sm:$0xff] }
 0x11f   : > { %v505_v19 = vpop.f32.mrb[0].mxu0 }
 0x120   : > { %v506_v20 = vadd.f32 %v1328_v18, %v505_v19  ;;  %v1383_v21 = vpop.f32.mrb[1].mxu0  ;;  %v717_v18 = vld [vmem:[%s2505_s7 + $0x240] sm:$0xff] }
 0x121   : > { %v721_v19 = vld [vmem:[%s2505_s7 + $0x260] sm:$0xff]  ;;  %v726_v21 = vld [vmem:[%s2505_s7 + $0x288] sm:$0xff] }
 0x122   : > { %v509_v22 = vmul.f32 -1.702, %v506_v20 }
 0x124   : > { %v510_v23 = vmul.f32 1.442695, %v509_v22  ;;  %v730_v22 = vld [vmem:[%s2505_s7 + $0x2a8] sm:$0xff] }
 0x126   : > { %1724 = vpow2.f32 %v510_v23  ;;  %v1480_v23 = vpack.c.bf16 %v730_v22, %v726_v21 }
 0x130   : > { %v1725_v24 = vpop.eup %1724 }
 0x131   : > { %v512_v25 = vadd.f32 1.0, %v1725_v24  ;;  %v725_v24 = vld [vmem:[%s2505_s7 + $0x280] sm:$0xff] }
 0x133   : > { %1726 = vrcp.f32 %v512_v25  ;;  %v729_v25 = vld [vmem:[%s2505_s7 + $0x2a0] sm:$0xff] }
 0x134   : > { %v1482_v26 = vpack.c.bf16 %v729_v25, %v725_v24  ;;  %v983_v24 = vld [vmem:[#allocation2 + $0x90] sm:$0xff]  ;;  %v550_v25 = vlaneseq }
 0x13d   : > { %v1727_v30 = vpop.eup %1726 }
 0x13e   : > { %v515_v32 = vmul.f32 %v1727_v30, %v506_v20  ;;  %v1478_v20 = vpack.c.bf16 %v721_v19, %v717_v18  ;;  %v733_v30 = vld [vmem:[%s2505_s7 + $0x2c0] sm:$0xff]  ;;  %v979_v18 = vld [vmem:[#allocation2 + $0x70] sm:$0xff]  ;;  %v982_v19 = vld [vmem:[#allocation2 + $0x88] sm:$0xff] }
 0x140   : > { %625 = vmatmul.mubr.f32.vlgmr.msra.gmra.mrb[0].mxu1 %v515_v32 }
 0x141   : > { %1443 = vmatpush1.bf16.msra.mxu1 %v1442_v31  ;;  %v737_v31 = vld [vmem:[%s2505_s7 + $0x2e0] sm:$0xff] }
 0x142   : > { %1445 = vmatprep.subr.bf16.mxu1 %v1444_v33  ;;  %v1486_v32 = vpack.c.bf16 %v737_v31, %v733_v30  ;;  %v742_v33 = vld [vmem:[%s2505_s7 + $0x308] sm:$0xff]  ;;  %v985_v30 = vld [vmem:[#allocation2 + $0xa0] sm:$0xff]  ;;  %v987_v31 = vld [vmem:[#allocation2 + $0xb0] sm:$0xff] }
 0x143   : > { %v1488_v35 = vpack.c.bf16 %v746_v34, %v742_v33  ;;  %v990_v33 = vld [vmem:[#allocation2 + $0xc8] sm:$0xff]  ;;  %v992_v34 = vld [vmem:[#allocation2 + $0xd8] sm:$0xff] }
 0x145   : > { %1447 = vmatpush1.bf16.msra.mxu1 %v1446_v38  ;;  %v1490_v38 = vpack.c.bf16 %v745_v37, %v741_v36  ;;  %v1592_v36 = vpack.c.bf16 %v992_v34, %v990_v33  ;;  %v989_v37 = vld [vmem:[#allocation2 + $0xc0] sm:$0xff]  ;;  %v687_v34 = vld [vmem:[%s2505_s7 + $0x150] sm:$0xff] }
 0x146   : > { %1449 = vmatprep.subr.bf16.mxu1 %v1448_v39  ;;  %v750_v39 = vld [vmem:[%s2505_s7 + $0x348] sm:$0xff] }
 0x147   : > { %v1492_v41 = vpack.c.bf16 %v754_v40, %v750_v39  ;;  %v994_v40 = vld [vmem:[#allocation2 + $0xe8] sm:$0xff] }
 0x149   : > { %1451 = vmatpush1.bf16.msra.mxu1 %v1450_v44  ;;  %v1494_v44 = vpack.c.bf16 %v753_v43, %v749_v42  ;;  %v548_v42 = vld [vmem:[%s2504_s6] sm:$0x3] }
 0x14a   : > { %1453 = vmatprep.subr.bf16.mxu1 %v1452_v45  ;;  %v758_v45 = vld [vmem:[%s2505_s7 + $0x388] sm:$0xff] }
 0x14b   : > { %v1496_v47 = vpack.c.bf16 %v762_v46, %v758_v45  ;;  %v993_v46 = vld [vmem:[#allocation2 + $0xe0] sm:$0xff] }
 0x14d   : > { %1455 = vmatpush1.bf16.msra.mxu1 %v1454_v50  ;;  %v1498_v50 = vpack.c.bf16 %v761_v49, %v757_v48 }
 0x14e   : > { %1457 = vmatprep.subr.bf16.mxu1 %v1456_v51  ;;  %v766_v51 = vld [vmem:[%s2505_s7 + $0x3c8] sm:$0xff] }
 0x14f   : > { %v1500_v53 = vpack.c.bf16 %v770_v52, %v766_v51 }
 0x151   : > { %1459 = vmatpush1.bf16.msra.mxu1 %v1458_v56  ;;  %v1502_v56 = vpack.c.bf16 %v769_v55, %v765_v54 }
 0x152   : > { %1461 = vmatprep.subr.bf16.mxu1 %v1460_v57  ;;  %v648_v57 = vld [vmem:[%s2505_s7 + $0x18] sm:$0xff] }
 0x153   : > { %v1504_v59 = vpack.c.bf16 %v652_v58, %v648_v57 }
 0x155   : > { %1463 = vmatpush1.bf16.msra.mxu1 %v1462_v62  ;;  %v965_v62 = vld [vmem:[#allocation2] sm:$0xff] }
 0x156   : > { %1465 = vmatprep.subr.bf16.mxu1 %v1464_v63  ;;  %v1568_v63 = vpack.c.bf16 %v968_v61, %v966_v60  ;;  %v1570_v3 = vpack.c.bf16 %v967_v0, %v965_v62  ;;  %v651_v0 = vld [vmem:[%s2505_s7 + $0x30] sm:$0xff] }
 0x158   : > { %1569 = vmatprep.subr.bf16.mxu0 %v1568_v63  ;;  %v647_v63 = vld [vmem:[%s2505_s7 + $0x10] sm:$0xff] }
 0x159   : > { %1467 = vmatpush1.bf16.msra.mxu1 %v1466_v4  ;;  %v1572_v4 = vpack.c.bf16 %v972_v2, %v970_v1  ;;  %1571 = vmatpush1.bf16.msra.mxu0 %v1570_v3  ;;  %v656_v2 = vld [vmem:[%s2505_s7 + $0x58] sm:$0xff] }
 0x15a   : > { %1469 = vmatprep.subr.bf16.mxu1 %v1468_v5  ;;  %v969_v5 = vld [vmem:[#allocation2 + $0x20] sm:$0xff]  ;;  %v660_v3 = vld [vmem:[%s2505_s7 + $0x78] sm:$0xff] }
 0x15b   : > { %v1574_v9 = vpack.c.bf16 %v971_v6, %v969_v5  ;;  %1573 = vmatprep.subr.bf16.mxu0 %v1572_v4  ;;  %v1506_v6 = vpack.c.bf16 %v651_v0, %v647_v63  ;;  %v732_v63 = vld [vmem:[%s2505_s7 + $0x2b8] sm:$0xff] }
 0x15d   : > { %1471 = vmatpush1.bf16.msra.mxu1 %v1470_v8  ;;  %v976_v8 = vld [vmem:[#allocation2 + $0x58] sm:$0xff]  ;;  %1575 = vmatpush1.bf16.msra.mxu0 %v1574_v9  ;;  %v655_v9 = vld [vmem:[%s2505_s7 + $0x50] sm:$0xff] }
 0x15e   : > { %1473 = vmatprep.subr.bf16.mxu1 %v1472_v11  ;;  %v1576_v10 = vpack.c.bf16 %v976_v8, %v974_v7  ;;  %v973_v11 = vld [vmem:[#allocation2 + $0x40] sm:$0xff]  ;;  %v1508_v8 = vpack.c.bf16 %v660_v3, %v656_v2  ;;  %v727_v2 = vld [vmem:[%s2505_s7 + $0x290] sm:$0xff] }
 0x15f   : > { %v1578_v15 = vpack.c.bf16 %v975_v12, %v973_v11  ;;  %v664_v11 = vld [vmem:[%s2505_s7 + $0x98] sm:$0xff]  ;;  %v731_v3 = vld [vmem:[%s2505_s7 + $0x2b0] sm:$0xff] }
 0x160   : > { %1577 = vmatprep.subr.bf16.mxu0 %v1576_v10  ;;  %v659_v10 = vld [vmem:[%s2505_s7 + $0x70] sm:$0xff]  ;;  %v668_v12 = vld [vmem:[%s2505_s7 + $0xb8] sm:$0xff] }
 0x161   : > { %1475 = vmatpush1.bf16.msra.mxu1 %v1474_v14  ;;  %v980_v14 = vld [vmem:[#allocation2 + $0x78] sm:$0xff]  ;;  %1579 = vmatpush1.bf16.msra.mxu0 %v1578_v15  ;;  %v663_v15 = vld [vmem:[%s2505_s7 + $0x90] sm:$0xff] }
 0x162   : > { %1477 = vmatprep.subr.bf16.mxu1 %v1476_v17  ;;  %v1580_v16 = vpack.c.bf16 %v980_v14, %v978_v13  ;;  %v977_v17 = vld [vmem:[#allocation2 + $0x60] sm:$0xff]  ;;  %v1510_v13 = vpack.c.bf16 %v659_v10, %v655_v9  ;;  %v1512_v14 = vpack.c.bf16 %v668_v12, %v664_v11  ;;  %v735_v9 = vld [vmem:[%s2505_s7 + $0x2d0] sm:$0xff]  ;;  %v744_v11 = vld [vmem:[%s2505_s7 + $0x318] sm:$0xff] }
 0x163   : > { %v1582_v21 = vpack.c.bf16 %v979_v18, %v977_v17  ;;  %v672_v17 = vld [vmem:[%s2505_s7 + $0xd8] sm:$0xff]  ;;  %v739_v10 = vld [vmem:[%s2505_s7 + $0x2f0] sm:$0xff] }
 0x164   : > { %1581 = vmatprep.subr.bf16.mxu0 %v1580_v16  ;;  %v667_v16 = vld [vmem:[%s2505_s7 + $0xb0] sm:$0xff]  ;;  %v676_v18 = vld [vmem:[%s2505_s7 + $0xf8] sm:$0xff] }
 0x165   : > { %1479 = vmatpush1.bf16.msra.mxu1 %v1478_v20  ;;  %v984_v20 = vld [vmem:[#allocation2 + $0x98] sm:$0xff]  ;;  %1583 = vmatpush1.bf16.msra.mxu0 %v1582_v21  ;;  %v671_v21 = vld [vmem:[%s2505_s7 + $0xd0] sm:$0xff] }
 0x166   : > { %1481 = vmatprep.subr.bf16.mxu1 %v1480_v23  ;;  %v1584_v22 = vpack.c.bf16 %v984_v20, %v982_v19  ;;  %v981_v23 = vld [vmem:[#allocation2 + $0x80] sm:$0xff]  ;;  %v1514_v19 = vpack.c.bf16 %v667_v16, %v663_v15  ;;  %v1516_v20 = vpack.c.bf16 %v676_v18, %v672_v17  ;;  %v748_v12 = vld [vmem:[%s2505_s7 + $0x338] sm:$0xff]  ;;  %v743_v15 = vld [vmem:[%s2505_s7 + $0x310] sm:$0xff] }
 0x167   : > { %v1586_v28 = vpack.c.bf16 %v983_v24, %v981_v23  ;;  %v680_v23 = vld [vmem:[%s2505_s7 + $0x118] sm:$0xff]  ;;  %v747_v16 = vld [vmem:[%s2505_s7 + $0x330] sm:$0xff] }
 0x168   : > { %1585 = vmatprep.subr.bf16.mxu0 %v1584_v22  ;;  %v675_v22 = vld [vmem:[%s2505_s7 + $0xf0] sm:$0xff]  ;;  %v684_v24 = vld [vmem:[%s2505_s7 + $0x138] sm:$0xff] }
 0x169   : > { %1483 = vmatpush1.bf16.msra.mxu1 %v1482_v26  ;;  %v986_v26 = vld [vmem:[#allocation2 + $0xa8] sm:$0xff]  ;;  %1587 = vmatpush1.bf16.msra.mxu0 %v1586_v28  ;;  %v683_v28 = vld [vmem:[%s2505_s7 + $0x130] sm:$0xff]  ;;  %v752_v17 = vld [vmem:[%s2505_s7 + $0x358] sm:$0xff] }
 0x16a   : > { %1485 = vmatprep.subr.bf16.mxu1 %v1484_v29  ;;  %v1588_v29 = vpack.c.bf16 %v988_v27, %v986_v26  ;;  %v1520_v26 = vpack.c.bf16 %v684_v24, %v680_v23  ;;  %v679_v27 = vld [vmem:[%s2505_s7 + $0x110] sm:$0xff]  ;;  %v756_v18 = vld [vmem:[%s2505_s7 + $0x378] sm:$0xff] }
 0x16b   : > { %v760_v23 = vld [vmem:[%s2505_s7 + $0x398] sm:$0xff] }
 0x16c   : > { %1589 = vmatprep.subr.bf16.mxu0 %v1588_v29  ;;  %v688_v29 = vld [vmem:[%s2505_s7 + $0x158] sm:$0xff] }
 0x16d   : > { %1487 = vmatpush1.bf16.msra.mxu1 %v1486_v32  ;;  %v2262_v32 = vshrl.u32 %v550_v25, 7  ;;  %v1518_v25 = vpack.c.bf16 %v675_v22, %v671_v21  ;;  %v751_v21 = vld [vmem:[%s2505_s7 + $0x350] sm:$0xff]  ;;  %v764_v24 = vld [vmem:[%s2505_s7 + $0x3b8] sm:$0xff] }
 0x16e   : > { %1489 = vmatprep.subr.bf16.mxu1 %v1488_v35  ;;  %v1590_v35 = vpack.c.bf16 %v987_v31, %v985_v30  ;;  %v692_v30 = vld [vmem:[%s2505_s7 + $0x178] sm:$0xff]  ;;  %v1522_v31 = vpack.c.bf16 %v683_v28, %v679_v27  ;;  %v755_v22 = vld [vmem:[%s2505_s7 + $0x370] sm:$0xff] }
 0x16f   : > { %v2265_v39 = vsub.s32 0, %v2262_v32  ;;  %v2271_v43 = vsub.s32 1, %v2262_v32  ;;  %v1524_v33 = vpack.c.bf16 %v692_v30, %v688_v29  ;;  %v759_v27 = vld [vmem:[%s2505_s7 + $0x390] sm:$0xff]  ;;  %v768_v29 = vld [vmem:[%s2505_s7 + $0x3d8] sm:$0xff] }
 0x170   : > { %1591 = vmatpush1.bf16.msra.mxu0 %v1590_v35  ;;  %v691_v35 = vld [vmem:[%s2505_s7 + $0x170] sm:$0xff]  ;;  %v772_v30 = vld [vmem:[%s2505_s7 + $0x3f8] sm:$0xff] }
 0x171   : > { %1491 = vmatpush1.bf16.msra.mxu1 %v1490_v38  ;;  %v991_v38 = vld [vmem:[#allocation2 + $0xd0] sm:$0xff]  ;;  %1593 = vmatprep.subr.bf16.mxu0 %v1592_v36  ;;  %v553_v48 = vrot.slane %v548_v42, %v2265_v39  ;;  %v557_v49 = vrot.slane %v548_v42, %v2271_v43  ;;  %v696_v36 = vld [vmem:[%s2505_s7 + $0x198] sm:$0xff] }
 0x172   : > { %1493 = vmatprep.subr.bf16.mxu1 %v1492_v41  ;;  %v996_v41 = vld [vmem:[#allocation2 + $0xf8] sm:$0xff]  ;;  %v699_v42 = vld [vmem:[%s2505_s7 + $0x1b0] sm:$0xff] }
 0x173   : > { %v1596_v45 = vpack.c.bf16 %v996_v41, %v994_v40  ;;  %v695_v41 = vld [vmem:[%s2505_s7 + $0x190] sm:$0xff] }
 0x174   : > { %v763_v28 = vld [vmem:[%s2505_s7 + $0x3b0] sm:$0xff] }
 0x175   : > { %1495 = vmatpush1.bf16.msra.mxu1 %v1494_v44  ;;  %v1594_v44 = vpack.c.bf16 %v991_v38, %v989_v37  ;;  %v700_v37 = vld [vmem:[%s2505_s7 + $0x1b8] sm:$0xff]  ;;  %v1526_v38 = vpack.c.bf16 %v691_v35, %v687_v34  ;;  %v767_v34 = vld [vmem:[%s2505_s7 + $0x3d0] sm:$0xff] }
 0x176   : > { %1497 = vmatprep.subr.bf16.mxu1 %v1496_v47  ;;  %v995_v47 = vld [vmem:[#allocation2 + $0xf0] sm:$0xff]  ;;  %v1528_v40 = vpack.c.bf16 %v700_v37, %v696_v36  ;;  %v998_v37 = vld [vmem:[#allocation2 + $0x108] sm:$0xff] }
 0x177   : > { %1595 = vmatpush1.bf16.msra.mxu0 %v1594_v44  ;;  %v704_v44 = vld [vmem:[%s2505_s7 + $0x1d8] sm:$0xff]  ;;  %v771_v35 = vld [vmem:[%s2505_s7 + $0x3f0] sm:$0xff] }
 0x178   : > { %1597 = vmatprep.subr.bf16.mxu0 %v1596_v45  ;;  %v708_v45 = vld [vmem:[%s2505_s7 + $0x1f8] sm:$0xff]  ;;  %v1566_v36 = vpack.c.bf16 %v771_v35, %v767_v34 }
 0x179   : > { %1499 = vmatpush1.bf16.msra.mxu1 %v1498_v50  ;;  %v1598_v50 = vpack.c.bf16 %v995_v47, %v993_v46  ;;  %v1530_v46 = vpack.c.bf16 %v699_v42, %v695_v41  ;;  %v1532_v47 = vpack.c.bf16 %v708_v45, %v704_v44  ;;  %v997_v41 = vld [vmem:[#allocation2 + $0x100] sm:$0xff]  ;;  %v999_v42 = vld [vmem:[#allocation2 + $0x110] sm:$0xff]  ;;  %v1002_v45 = vld [vmem:[#allocation2 + $0x128] sm:$0xff] }
 0x17a   : > { %1501 = vmatprep.subr.bf16.mxu1 %v1500_v53  ;;  %v1602_v44 = vpack.c.bf16 %v999_v42, %v997_v41 }
 0x17b   : > { %1599 = vmatpush1.bf16.msra.mxu0 %v1598_v50  ;;  %v712_v50 = vld [vmem:[%s2505_s7 + $0x218] sm:$0xff] }
 0x17d   : > { %1503 = vmatpush1.bf16.msra.mxu1 %v1502_v56 }
 0x17e   : > { %1505 = vmatprep.subr.bf16.mxu1 %v1504_v59 }
 0x213   : > { %v626_v51 = vpop.f32.mrb[0].mxu1 }
 0x214   : > { %v627_v52 = vadd.f32 %v626_v51, %v553_v48  ;;  %v628_v53 = vpop.f32.mrb[1].mxu1  ;;  %v703_v48 = vld [vmem:[%s2505_s7 + $0x1d0] sm:$0xff]  ;;  %v716_v51 = vld [vmem:[%s2505_s7 + $0x238] sm:$0xff] }
 0x215   : > { %v629_v54 = vadd.f32 %v628_v53, %v557_v49  ;;  %v707_v49 = vld [vmem:[%s2505_s7 + $0x1f0] sm:$0xff]  ;;  %v1536_v53 = vpack.c.bf16 %v716_v51, %v712_v50  ;;  %v1006_v51 = vld [vmem:[#allocation2 + $0x148] sm:$0xff] }
 0x216   : > { %v631_v55 = vmul.f32 -1.702, %v627_v52 }
 0x217   : > { %v632_v56 = vmul.f32 -1.702, %v629_v54 }
 0x218   : > { %v633_v57 = vmul.f32 1.442695, %v631_v55  ;;  %v715_v55 = vld [vmem:[%s2505_s7 + $0x230] sm:$0xff] }
 0x219   : > { %v635_v58 = vmul.f32 1.442695, %v632_v56  ;;  %v720_v56 = vld [vmem:[%s2505_s7 + $0x258] sm:$0xff] }
 0x21a   : > { %1728 = vpow2.f32 %v633_v57  ;;  %v724_v57 = vld [vmem:[%s2505_s7 + $0x278] sm:$0xff] }
 0x21b   : > { %1730 = vpow2.f32 %v635_v58 }
 0x224   : > { %v1729_v59 = vpop.eup %1728 }
 0x225   : > { %v1731_v60 = vpop.eup %1730  ;;  %v637_v61 = vadd.f32 1.0, %v1729_v59  ;;  %v1540_v59 = vpack.c.bf16 %v724_v57, %v720_v56  ;;  %v1010_v56 = vld [vmem:[#allocation2 + $0x168] sm:$0xff]  ;;  %v1012_v57 = vld [vmem:[#allocation2 + $0x178] sm:$0xff] }
 0x226   : > { %v638_v62 = vadd.f32 1.0, %v1731_v60  ;;  %v719_v60 = vld [vmem:[%s2505_s7 + $0x250] sm:$0xff] }
 0x227   : > { %1732 = vrcp.f32 %v637_v61  ;;  %v723_v61 = vld [vmem:[%s2505_s7 + $0x270] sm:$0xff] }
 0x228   : > { %1734 = vrcp.f32 %v638_v62  ;;  %v728_v62 = vld [vmem:[%s2505_s7 + $0x298] sm:$0xff]  ;;  %v1542_v0 = vpack.c.bf16 %v723_v61, %v719_v60  ;;  %v1011_v60 = vld [vmem:[#allocation2 + $0x170] sm:$0xff] }
 0x231   : > { %v1733_v1 = vpop.eup %1732 }
 0x232   : > { %v1735_v4 = vpop.eup %1734  ;;  %v2287_v7 = vmul.f32 %v1733_v1, %v627_v52  ;;  %v1534_v52 = vpack.c.bf16 %v707_v49, %v703_v48  ;;  %v1544_v1 = vpack.c.bf16 %v732_v63, %v728_v62  ;;  %v1001_v48 = vld [vmem:[#allocation2 + $0x120] sm:$0xff]  ;;  %v1003_v49 = vld [vmem:[#allocation2 + $0x130] sm:$0xff]  ;;  %v1014_v62 = vld [vmem:[#allocation2 + $0x188] sm:$0xff] }
 0x233   : > { %v644_v5 = vmul.f32 %v1735_v4, %v629_v54  ;;  %v711_v54 = vld [vmem:[%s2505_s7 + $0x210] sm:$0xff]  ;;  %v736_v4 = vld [vmem:[%s2505_s7 + $0x2d8] sm:$0xff]  ;;  %v1606_v50 = vpack.c.bf16 %v1003_v49, %v1001_v48 }
 0x234   : > { %v1538_v58 = vpack.c.bf16 %v715_v55, %v711_v54  ;;  %v1007_v54 = vld [vmem:[#allocation2 + $0x150] sm:$0xff]  ;;  %v1016_v63 = vld [vmem:[#allocation2 + $0x198] sm:$0xff] }
 0x235   : > { %859 = vmatprep.mubr.f32.mxu1 %v644_v5  ;;  %v1036_v48 = vld [vmem:[#allocation2 + $0x238] sm:$0xff] }
 0x236   : > { %860 = vmatmul.mubr.f32.vlgmr.msra.gmra.mrb[2].mxu1 %v2287_v7 }
 0x237   : > { %1507 = vmatpush1.bf16.msra.mxu1 %v1506_v6  ;;  %930 = vmatprep.mubr.f32.mxu1 %v644_v5  ;;  %v740_v5 = vld [vmem:[%s2505_s7 + $0x2f8] sm:$0xff]  ;;  %v1546_v6 = vpack.c.bf16 %v731_v3, %v727_v2  ;;  %v1015_v2 = vld [vmem:[#allocation2 + $0x190] sm:$0xff] }
 0x238   : > { %1509 = vmatprep.subr.bf16.mxu1 %v1508_v8  ;;  %v1548_v8 = vpack.c.bf16 %v740_v5, %v736_v4  ;;  %v1018_v4 = vld [vmem:[#allocation2 + $0x1a8] sm:$0xff]  ;;  %v1020_v5 = vld [vmem:[#allocation2 + $0x1b8] sm:$0xff] }
 0x23b   : > { %1511 = vmatpush1.bf16.msra.mxu1 %v1510_v13  ;;  %v1550_v13 = vpack.c.bf16 %v739_v10, %v735_v9  ;;  %v1019_v9 = vld [vmem:[#allocation2 + $0x1b0] sm:$0xff] }
 0x23c   : > { %1513 = vmatprep.subr.bf16.mxu1 %v1512_v14  ;;  %v1552_v14 = vpack.c.bf16 %v748_v12, %v744_v11  ;;  %v1022_v11 = vld [vmem:[#allocation2 + $0x1c8] sm:$0xff]  ;;  %v1024_v12 = vld [vmem:[#allocation2 + $0x1d8] sm:$0xff] }
 0x23f   : > { %1515 = vmatpush1.bf16.msra.mxu1 %v1514_v19  ;;  %v1554_v19 = vpack.c.bf16 %v747_v16, %v743_v15  ;;  %v1023_v15 = vld [vmem:[#allocation2 + $0x1d0] sm:$0xff] }
 0x240   : > { %1517 = vmatprep.subr.bf16.mxu1 %v1516_v20  ;;  %v1556_v20 = vpack.c.bf16 %v756_v18, %v752_v17  ;;  %v1026_v17 = vld [vmem:[#allocation2 + $0x1e8] sm:$0xff]  ;;  %v1028_v18 = vld [vmem:[#allocation2 + $0x1f8] sm:$0xff] }
 0x243   : > { %1519 = vmatpush1.bf16.msra.mxu1 %v1518_v25  ;;  %v1558_v25 = vpack.c.bf16 %v755_v22, %v751_v21  ;;  %v1027_v21 = vld [vmem:[#allocation2 + $0x1f0] sm:$0xff] }
 0x244   : > { %1521 = vmatprep.subr.bf16.mxu1 %v1520_v26  ;;  %v1560_v26 = vpack.c.bf16 %v764_v24, %v760_v23  ;;  %v1030_v23 = vld [vmem:[#allocation2 + $0x208] sm:$0xff]  ;;  %v1032_v24 = vld [vmem:[#allocation2 + $0x218] sm:$0xff] }
 0x247   : > { %1523 = vmatpush1.bf16.msra.mxu1 %v1522_v31  ;;  %v1562_v31 = vpack.c.bf16 %v763_v28, %v759_v27 }
 0x248   : > { %1525 = vmatprep.subr.bf16.mxu1 %v1524_v33  ;;  %v1564_v33 = vpack.c.bf16 %v772_v30, %v768_v29 }
 0x24b   : > { %1527 = vmatpush1.bf16.msra.mxu1 %v1526_v38  ;;  %v1000_v38 = vld [vmem:[#allocation2 + $0x118] sm:$0xff] }
 0x24c   : > { %1529 = vmatprep.subr.bf16.mxu1 %v1528_v40  ;;  %v1600_v40 = vpack.c.bf16 %v1000_v38, %v998_v37 }
 0x24e   : > { %1601 = vmatprep.subr.bf16.mxu0 %v1600_v40 }
 0x24f   : > { %1531 = vmatpush1.bf16.msra.mxu1 %v1530_v46  ;;  %1603 = vmatpush1.bf16.msra.mxu0 %v1602_v44  ;;  %v1004_v46 = vld [vmem:[#allocation2 + $0x138] sm:$0xff]  ;;  %v1029_v44 = vld [vmem:[#allocation2 + $0x200] sm:$0xff] }
 0x250   : > { %1533 = vmatprep.subr.bf16.mxu1 %v1532_v47  ;;  %v1604_v47 = vpack.c.bf16 %v1004_v46, %v1002_v45  ;;  %v1031_v45 = vld [vmem:[#allocation2 + $0x210] sm:$0xff] }
 0x252   : > { %1605 = vmatprep.subr.bf16.mxu0 %v1604_v47  ;;  %v1034_v47 = vld [vmem:[#allocation2 + $0x228] sm:$0xff] }
 0x253   : > { %1535 = vmatpush1.bf16.msra.mxu1 %v1534_v52  ;;  %1607 = vmatpush1.bf16.msra.mxu0 %v1606_v50  ;;  %v1008_v52 = vld [vmem:[#allocation2 + $0x158] sm:$0xff] }
 0x254   : > { %1537 = vmatprep.subr.bf16.mxu1 %v1536_v53  ;;  %v1608_v53 = vpack.c.bf16 %v1008_v52, %v1006_v51  ;;  %v1634_v51 = vpack.c.bf16 %v1031_v45, %v1029_v44 }
 0x256   : > { %1609 = vmatprep.subr.bf16.mxu0 %v1608_v53  ;;  %v1636_v53 = vpack.c.bf16 %v1036_v48, %v1034_v47  ;;  %v1065_v48 = vld [vmem:[#allocation2 + $0x320] sm:$0xff] }
 0x257   : > { %1539 = vmatpush1.bf16.msra.mxu1 %v1538_v58  ;;  %v1612_v58 = vpack.c.bf16 %v1012_v57, %v1010_v56  ;;  %v1040_v56 = vld [vmem:[#allocation2 + $0x258] sm:$0xff] }
 0x258   : > { %1541 = vmatprep.subr.bf16.mxu1 %v1540_v59  ;;  %v1009_v59 = vld [vmem:[#allocation2 + $0x160] sm:$0xff] }
 0x259   : > { %v1614_v61 = vpack.c.bf16 %v1011_v60, %v1009_v59  ;;  %v1037_v59 = vld [vmem:[#allocation2 + $0x240] sm:$0xff]  ;;  %v1039_v60 = vld [vmem:[#allocation2 + $0x250] sm:$0xff] }
 0x25b   : > { %1543 = vmatpush1.bf16.msra.mxu1 %v1542_v0  ;;  %v1616_v0 = vpack.c.bf16 %v1016_v63, %v1014_v62  ;;  %v1044_v62 = vld [vmem:[#allocation2 + $0x278] sm:$0xff]  ;;  %v1642_v63 = vpack.c.bf16 %v1039_v60, %v1037_v59  ;;  %v1074_v59 = vld [vmem:[#allocation2 + $0x368] sm:$0xff] }
 0x25c   : > { %1545 = vmatprep.subr.bf16.mxu1 %v1544_v1  ;;  %v1013_v1 = vld [vmem:[#allocation2 + $0x180] sm:$0xff]  ;;  %v1076_v60 = vld [vmem:[#allocation2 + $0x378] sm:$0xff] }
 0x25d   : > { %v1618_v3 = vpack.c.bf16 %v1015_v2, %v1013_v1  ;;  %v1041_v1 = vld [vmem:[#allocation2 + $0x260] sm:$0xff]  ;;  %v1043_v2 = vld [vmem:[#allocation2 + $0x270] sm:$0xff] }
 0x25f   : > { %1547 = vmatpush1.bf16.msra.mxu1 %v1546_v6  ;;  %v1620_v6 = vpack.c.bf16 %v1020_v5, %v1018_v4  ;;  %v1048_v4 = vld [vmem:[#allocation2 + $0x298] sm:$0xff]  ;;  %v1646_v5 = vpack.c.bf16 %v1043_v2, %v1041_v1  ;;  %v1078_v1 = vld [vmem:[#allocation2 + $0x388] sm:$0xff] }
 0x260   : > { %1549 = vmatprep.subr.bf16.mxu1 %v1548_v8  ;;  %v1017_v8 = vld [vmem:[#allocation2 + $0x1a0] sm:$0xff]  ;;  %v1080_v2 = vld [vmem:[#allocation2 + $0x398] sm:$0xff] }
 0x261   : > { %v1622_v10 = vpack.c.bf16 %v1019_v9, %v1017_v8  ;;  %v1045_v8 = vld [vmem:[#allocation2 + $0x280] sm:$0xff]  ;;  %v1047_v9 = vld [vmem:[#allocation2 + $0x290] sm:$0xff] }
 0x263   : > { %1551 = vmatpush1.bf16.msra.mxu1 %v1550_v13  ;;  %v1624_v13 = vpack.c.bf16 %v1024_v12, %v1022_v11  ;;  %v1052_v11 = vld [vmem:[#allocation2 + $0x2b8] sm:$0xff]  ;;  %v1650_v12 = vpack.c.bf16 %v1047_v9, %v1045_v8  ;;  %v1082_v8 = vld [vmem:[#allocation2 + $0x3a8] sm:$0xff] }
 0x264   : > { %1553 = vmatprep.subr.bf16.mxu1 %v1552_v14  ;;  %v1021_v14 = vld [vmem:[#allocation2 + $0x1c0] sm:$0xff]  ;;  %v1084_v9 = vld [vmem:[#allocation2 + $0x3b8] sm:$0xff] }
 0x265   : > { %v1626_v16 = vpack.c.bf16 %v1023_v15, %v1021_v14  ;;  %v1049_v14 = vld [vmem:[#allocation2 + $0x2a0] sm:$0xff]  ;;  %v1051_v15 = vld [vmem:[#allocation2 + $0x2b0] sm:$0xff] }
 0x267   : > { %1555 = vmatpush1.bf16.msra.mxu1 %v1554_v19  ;;  %v1628_v19 = vpack.c.bf16 %v1028_v18, %v1026_v17  ;;  %v1056_v17 = vld [vmem:[#allocation2 + $0x2d8] sm:$0xff]  ;;  %v1654_v18 = vpack.c.bf16 %v1051_v15, %v1049_v14  ;;  %v1083_v14 = vld [vmem:[#allocation2 + $0x3b0] sm:$0xff] }
 0x268   : > { %1557 = vmatprep.subr.bf16.mxu1 %v1556_v20  ;;  %v1025_v20 = vld [vmem:[#allocation2 + $0x1e0] sm:$0xff] }
 0x269   : > { %v1630_v22 = vpack.c.bf16 %v1027_v21, %v1025_v20  ;;  %v1053_v20 = vld [vmem:[#allocation2 + $0x2c0] sm:$0xff]  ;;  %v1055_v21 = vld [vmem:[#allocation2 + $0x2d0] sm:$0xff] }
 0x26b   : > { %1559 = vmatpush1.bf16.msra.mxu1 %v1558_v25  ;;  %v1632_v25 = vpack.c.bf16 %v1032_v24, %v1030_v23  ;;  %v1060_v23 = vld [vmem:[#allocation2 + $0x2f8] sm:$0xff]  ;;  %v1658_v24 = vpack.c.bf16 %v1055_v21, %v1053_v20 }
 0x26c   : > { %1561 = vmatprep.subr.bf16.mxu1 %v1560_v26  ;;  %v2468_v26 = vld [vmem:[%s2506_s8] sm:$0xf] }
 0x26d   : > { %v778_v27 = vrot.slane %v2468_v26, %v2265_v39  ;;  %v782_v28 = vrot.slane %v2468_v26, %v2271_v43 }
 0x26f   : > { %1563 = vmatpush1.bf16.msra.mxu1 %v1562_v31 }
 0x270   : > { %1565 = vmatprep.subr.bf16.mxu1 %v1564_v33 }
 0x273   : > { %1567 = vmatpush1.bf16.msra.mxu1 %v1566_v36 }
 0x276   : > { %931 = vmatmul.mubr.f32.vlgmr.msra.gmra.mrb[4].mxu1 %v2287_v7  ;;  %v1005_v7 = vld [vmem:[#allocation2 + $0x140] sm:$0xff] }
 0x277   : > { %v1610_v55 = vpack.c.bf16 %v1007_v54, %v1005_v7  ;;  %v1033_v7 = vld [vmem:[#allocation2 + $0x220] sm:$0xff]  ;;  %v1035_v54 = vld [vmem:[#allocation2 + $0x230] sm:$0xff] }
 0x278   : > { %v1638_v57 = vpack.c.bf16 %v1035_v54, %v1033_v7 }
 0x279   : > { %1611 = vmatpush1.bf16.msra.mxu0 %v1610_v55  ;;  %v1038_v55 = vld [vmem:[#allocation2 + $0x248] sm:$0xff] }
 0x27a   : > { %1613 = vmatprep.subr.bf16.mxu0 %v1612_v58  ;;  %v1640_v58 = vpack.c.bf16 %v1040_v56, %v1038_v55  ;;  %v1069_v56 = vld [vmem:[#allocation2 + $0x340] sm:$0xff] }
 0x27d   : > { %1615 = vmatpush1.bf16.msra.mxu0 %v1614_v61  ;;  %v1042_v61 = vld [vmem:[#allocation2 + $0x268] sm:$0xff] }
 0x27e   : > { %1617 = vmatprep.subr.bf16.mxu0 %v1616_v0  ;;  %v1644_v0 = vpack.c.bf16 %v1044_v62, %v1042_v61  ;;  %v1676_v62 = vpack.c.bf16 %v1076_v60, %v1074_v59 }
 0x281   : > { %1619 = vmatpush1.bf16.msra.mxu0 %v1618_v3  ;;  %v1046_v3 = vld [vmem:[#allocation2 + $0x288] sm:$0xff] }
 0x282   : > { %1621 = vmatprep.subr.bf16.mxu0 %v1620_v6  ;;  %v1648_v6 = vpack.c.bf16 %v1048_v4, %v1046_v3  ;;  %v1680_v4 = vpack.c.bf16 %v1080_v2, %v1078_v1 }
 0x285   : > { %1623 = vmatpush1.bf16.msra.mxu0 %v1622_v10  ;;  %v1050_v10 = vld [vmem:[#allocation2 + $0x2a8] sm:$0xff] }
 0x286   : > { %1625 = vmatprep.subr.bf16.mxu0 %v1624_v13  ;;  %v1652_v13 = vpack.c.bf16 %v1052_v11, %v1050_v10 }
 0x289   : > { %1627 = vmatpush1.bf16.msra.mxu0 %v1626_v16  ;;  %v1054_v16 = vld [vmem:[#allocation2 + $0x2c8] sm:$0xff] }
 0x28a   : > { %1629 = vmatprep.subr.bf16.mxu0 %v1628_v19  ;;  %v1656_v19 = vpack.c.bf16 %v1056_v17, %v1054_v16  ;;  %v1086_v17 = vld [vmem:[#allocation2 + $0x3c8] sm:$0xff] }
 0x28d   : > { %1631 = vmatpush1.bf16.msra.mxu0 %v1630_v22  ;;  %v1058_v22 = vld [vmem:[#allocation2 + $0x2e8] sm:$0xff] }
 0x28e   : > { %1633 = vmatprep.subr.bf16.mxu0 %v1632_v25  ;;  %v1660_v25 = vpack.c.bf16 %v1060_v23, %v1058_v22  ;;  %v1085_v22 = vld [vmem:[#allocation2 + $0x3c0] sm:$0xff]  ;;  %v1087_v23 = vld [vmem:[#allocation2 + $0x3d0] sm:$0xff] }
 0x309   : > { %v861_v29 = vpop.f32.mrb[2].mxu1 }
 0x30a   : > { %v862_v30 = vadd.f32 %v861_v29, %v778_v27  ;;  %v863_v31 = vpop.f32.mrb[3].mxu1  ;;  %v785_v27 = vsub.s32 2, %v2262_v32  ;;  %v1059_v29 = vld [vmem:[#allocation2 + $0x2f0] sm:$0xff] }
 0x30b   : > { %v864_v33 = vadd.f32 %v863_v31, %v782_v28  ;;  %v1057_v28 = vld [vmem:[#allocation2 + $0x2e0] sm:$0xff]  ;;  %v1062_v31 = vld [vmem:[#allocation2 + $0x308] sm:$0xff] }
 0x30c   : > { %v937_v34 = vmul.f32 -1.702, %v862_v30 }
 0x30d   : > { %v938_v35 = vmul.f32 -1.702, %v864_v33 }
 0x30e   : > { %v941_v36 = vmul.f32 1.442695, %v937_v34  ;;  %v1662_v34 = vpack.c.bf16 %v1059_v29, %v1057_v28  ;;  %v1089_v29 = vld [vmem:[#allocation2 + $0x3e0] sm:$0xff] }
 0x30f   : > { %v943_v37 = vmul.f32 1.442695, %v938_v35  ;;  %v786_v35 = vrot.slane %v2468_v26, %v785_v27  ;;  %v1690_v27 = vpack.c.bf16 %v1087_v23, %v1085_v22 }
 0x310   : > { %1736 = vpow2.f32 %v941_v36 }
 0x311   : > { %1738 = vpow2.f32 %v943_v37  ;;  %v1061_v37 = vld [vmem:[#allocation2 + $0x300] sm:$0xff] }
 0x31a   : > { %v1737_v38 = vpop.eup %1736 }
 0x31b   : > { %v1739_v40 = vpop.eup %1738  ;;  %v949_v41 = vadd.f32 1.0, %v1737_v38  ;;  %v1063_v38 = vld [vmem:[#allocation2 + $0x310] sm:$0xff] }
 0x31c   : > { %v950_v42 = vadd.f32 1.0, %v1739_v40  ;;  %v1666_v45 = vpack.c.bf16 %v1063_v38, %v1061_v37  ;;  %v1093_v37 = vld [vmem:[%s2508_s10] sm:$0x3] }
 0x31d   : > { %1740 = vrcp.f32 %v949_v41  ;;  %v1066_v41 = vld [vmem:[#allocation2 + $0x328] sm:$0xff]  ;;  %v1098_v38 = vrot.slane %v1093_v37, %v2265_v39 }
 0x31e   : > { %1742 = vrcp.f32 %v950_v42  ;;  %v1068_v42 = vld [vmem:[#allocation2 + $0x338] sm:$0xff] }
 0x31f   : > { %v1668_v47 = vpack.c.bf16 %v1068_v42, %v1066_v41 }
 0x327   : > { %v1741_v46 = vpop.eup %1740 }
 0x328   : > { %v1743_v49 = vpop.eup %1742  ;;  %v961_v52 = vmul.f32 %v1741_v46, %v862_v30  ;;  %v789_v30 = vsub.s32 3, %v2262_v32 }
 0x329   : > { %v962_v50 = vmul.f32 %v1743_v49, %v864_v33  ;;  %v1064_v33 = vld [vmem:[#allocation2 + $0x318] sm:$0xff]  ;;  %v1067_v49 = vld [vmem:[#allocation2 + $0x330] sm:$0xff] }
 0x32a   : > { %v1664_v36 = vpack.c.bf16 %v1064_v33, %v1062_v31  ;;  %v790_v40 = vrot.slane %v2468_v26, %v789_v30  ;;  %v1670_v7 = vpack.c.bf16 %v1067_v49, %v1065_v48  ;;  %v1091_v30 = vld [vmem:[#allocation2 + $0x3f0] sm:$0xff] }
 0x32b   : > { %1169 = vmatprep.mubr.f32.mxu0 %v962_v50  ;;  %v1694_v31 = vpack.c.bf16 %v1091_v30, %v1089_v29 }
 0x32c   : > { %1170 = vmatmul.mubr.f32.vlgmr.msra.gmra.mrb[2].mxu0 %v961_v52  ;;  %v1072_v52 = vld [vmem:[#allocation2 + $0x358] sm:$0xff] }
 0x32d   : > { %1635 = vmatpush1.bf16.msra.mxu0 %v1634_v51  ;;  %v1070_v51 = vld [vmem:[#allocation2 + $0x348] sm:$0xff] }
 0x32e   : > { %1637 = vmatprep.subr.bf16.mxu0 %v1636_v53  ;;  %v1672_v55 = vpack.c.bf16 %v1072_v52, %v1070_v51 }
 0x331   : > { %1639 = vmatpush1.bf16.msra.mxu0 %v1638_v57  ;;  %v1071_v57 = vld [vmem:[#allocation2 + $0x350] sm:$0xff] }
 0x332   : > { %1641 = vmatprep.subr.bf16.mxu0 %v1640_v58  ;;  %v1674_v61 = vpack.c.bf16 %v1071_v57, %v1069_v56 }
 0x335   : > { %1643 = vmatpush1.bf16.msra.mxu0 %v1642_v63  ;;  %v1073_v63 = vld [vmem:[#allocation2 + $0x360] sm:$0xff] }
 0x336   : > { %1645 = vmatprep.subr.bf16.mxu0 %v1644_v0  ;;  %v1075_v0 = vld [vmem:[#allocation2 + $0x370] sm:$0xff] }
 0x337   : > { %v1678_v3 = vpack.c.bf16 %v1075_v0, %v1073_v63 }
 0x339   : > { %1647 = vmatpush1.bf16.msra.mxu0 %v1646_v5  ;;  %v1077_v5 = vld [vmem:[#allocation2 + $0x380] sm:$0xff] }
 0x33a   : > { %1649 = vmatprep.subr.bf16.mxu0 %v1648_v6  ;;  %v1079_v6 = vld [vmem:[#allocation2 + $0x390] sm:$0xff] }
 0x33b   : > { %v1682_v10 = vpack.c.bf16 %v1079_v6, %v1077_v5 }
 0x33d   : > { %1651 = vmatpush1.bf16.msra.mxu0 %v1650_v12  ;;  %v1684_v12 = vpack.c.bf16 %v1084_v9, %v1082_v8 }
 0x33e   : > { %1653 = vmatprep.subr.bf16.mxu0 %v1652_v13  ;;  %v1081_v13 = vld [vmem:[#allocation2 + $0x3a0] sm:$0xff] }
 0x33f   : > { %v1686_v20 = vpack.c.bf16 %v1083_v14, %v1081_v13 }
 0x341   : > { %1655 = vmatpush1.bf16.msra.mxu0 %v1654_v18  ;;  %v1088_v18 = vld [vmem:[#allocation2 + $0x3d8] sm:$0xff] }
 0x342   : > { %1657 = vmatprep.subr.bf16.mxu0 %v1656_v19  ;;  %v1688_v21 = vpack.c.bf16 %v1088_v18, %v1086_v17 }
 0x345   : > { %1659 = vmatpush1.bf16.msra.mxu0 %v1658_v24  ;;  %v1090_v24 = vld [vmem:[#allocation2 + $0x3e8] sm:$0xff] }
 0x346   : > { %1661 = vmatprep.subr.bf16.mxu0 %v1660_v25  ;;  %v1092_v25 = vld [vmem:[#allocation2 + $0x3f8] sm:$0xff] }
 0x347   : > { %v1692_v28 = vpack.c.bf16 %v1092_v25, %v1090_v24 }
 0x349   : > { %v932_v44 = vpop.f32.mrb[4].mxu1  ;;  %1663 = vmatpush1.bf16.msra.mxu0 %v1662_v34 }
 0x34a   : > { %v2478_v46 = vadd.f32 %v932_v44, %v786_v35  ;;  %v934_v32 = vpop.f32.mrb[5].mxu1  ;;  %1665 = vmatprep.subr.bf16.mxu0 %v1664_v36 }
 0x34b   : > { %v2480_v50 = vadd.f32 %v934_v32, %v790_v40  ;;  %v1102_v40 = vrot.slane %v1093_v37, %v2271_v43 }
 0x34c   : > { %v939_v53 = vmul.f32 -1.702, %v2478_v46 }
 0x34d   : > { %v940_v26 = vmul.f32 -1.702, %v2480_v50  ;;  %1667 = vmatpush1.bf16.msra.mxu0 %v1666_v45 }
 0x34e   : > { %v945_v54 = vmul.f32 1.442695, %v939_v53  ;;  %1669 = vmatprep.subr.bf16.mxu0 %v1668_v47 }
 0x34f   : > { %v947_v58 = vmul.f32 1.442695, %v940_v26 }
 0x350   : > { %1744 = vpow2.f32 %v945_v54 }
 0x351   : > { %1746 = vpow2.f32 %v947_v58  ;;  %1671 = vmatpush1.bf16.msra.mxu0 %v1670_v7 }
 0x352   : > { %1673 = vmatprep.subr.bf16.mxu0 %v1672_v55 }
 0x355   : > { %1675 = vmatpush1.bf16.msra.mxu0 %v1674_v61 }
 0x356   : > { %1677 = vmatprep.subr.bf16.mxu0 %v1676_v62 }
 0x359   : > { %1679 = vmatpush1.bf16.msra.mxu0 %v1678_v3 }
 0x35a   : > { %v1745_v11 = vpop.eup %1744  ;;  %1681 = vmatprep.subr.bf16.mxu0 %v1680_v4 }
 0x35b   : > { %v1747_v15 = vpop.eup %1746  ;;  %v951_v16 = vadd.f32 1.0, %v1745_v11 }
 0x35c   : > { %v952_v19 = vadd.f32 1.0, %v1747_v15 }
 0x35d   : > { %1748 = vrcp.f32 %v951_v16  ;;  %1683 = vmatpush1.bf16.msra.mxu0 %v1682_v10 }
 0x35e   : > { %1750 = vrcp.f32 %v952_v19  ;;  %1685 = vmatprep.subr.bf16.mxu0 %v1684_v12 }
 0x361   : > { %1687 = vmatpush1.bf16.msra.mxu0 %v1686_v20 }
 0x362   : > { %1689 = vmatprep.subr.bf16.mxu0 %v1688_v21 }
 0x365   : > { %1691 = vmatpush1.bf16.msra.mxu0 %v1690_v27 }
 0x366   : > { %1693 = vmatprep.subr.bf16.mxu0 %v1692_v28 }
 0x367   : > { %v1749_v33 = vpop.eup %1748 }
 0x368   : > { %v1751_v34 = vpop.eup %1750  ;;  %v963_v36 = vmul.f32 %v1749_v33, %v2478_v46 }
 0x369   : > { %v964_v35 = vmul.f32 %v1751_v34, %v2480_v50  ;;  %1695 = vmatpush1.bf16.msra.mxu0 %v1694_v31 }
 0x36b   : > { %1240 = vmatprep.mubr.f32.mxu0 %v964_v35 }
 0x36c   : > { %1241 = vmatmul.mubr.f32.vlgmr.msra.gmra.mrb[2].mxu0 %v963_v36 }
 0x43f   : > { %v1242_v41 = vpop.f32.mrb[2].mxu0 }
 0x440   : > { %v1696_v42 = vadd.f32 %v1242_v41, %v1098_v38  ;;  %v1244_v44 = vpop.f32.mrb[3].mxu0 }
 0x441   : > { %v1697_v45 = vadd.f32 %v1244_v44, %v1102_v40 }
 0x442   : > { %1247 = vst [vmem:[%s398_s13] sm:$0xff] %v1696_v42 }
 0x443   : > { %1248 = vst [vmem:[%s398_s13 + $0x8] sm:$0xff] %v1697_v45 }
 0x444 PF: > { %s22_s17 = sadd.s32 1, %s1790_s17  }
 0x445   : > { %p19_p3 = scmp.ge.s32.totalorder %s22_s17, 4  }
 0x447   :  { %21 = sbr.rel (!%p19_p3) target bundleno = 1 (0x1), region = 99 }
 0x44e   :  { %1270 = vsyncpa [#allocation3], 1 }
 0x44f   :  { %1272 = vsyncpa [#allocation3 + $0x1], 1 }

</bundles_post_ra>
